<compile_context>
chip_gen: v7x
topology: tpu7x:2x2x1
jax: 0.10.0
libtpu: 0.0.40
codegen_flags: <defaults>
</compile_context>

<pallas_src>
import functools

import jax
import jax.numpy as jnp
from jax import lax
from jax.experimental import pallas as pl
from jax.experimental.pallas import tpu as pltpu


_NEG = -1e30  # "minus infinity" that stays finite under repeated adds (f32)


def bert_cnn_kernel(x_ref, w_all_ref, b1_ref, b2_ref, b3_ref, wc_ref, bc_ref,
                    out_ref, halo_ref, max1_ref, max2_ref, max3_ref,
                    *, tb, ts, channels):
    C = channels
    rows = tb * ts
    H = x_ref.shape[-1]
    t = pl.program_id(1)
    nt = pl.num_programs(1)

    @pl.when(t == 0)
    def _init():
        halo_ref[...] = jnp.full((tb, 3, 9 * C), _NEG, jnp.float32)
        max1_ref[...] = jnp.full((tb, C), _NEG, jnp.float32)
        max2_ref[...] = jnp.full((tb, C), _NEG, jnp.float32)
        max3_ref[...] = jnp.full((tb, C), _NEG, jnp.float32)

    # In-kernel bf16 cast (hides under the MXU; avoids a separate host-side
    # HBM read+write pass over x).  ts % 8 == 0 -> the reshape only regroups
    # whole sublane tiles.
    x = x_ref[...].reshape(rows, H).astype(jnp.bfloat16)

    # One wide MXU call covering all 3 convs x all taps for this time chunk.
    z2 = jnp.dot(x, w_all_ref[...], preferred_element_type=jnp.float32)  # [rows, 9C]
    z3 = z2.reshape(tb, ts, 9 * C)

    # Halo: previous chunk's last 3 z rows (NEG for the first chunk).
    h = halo_ref[...]                          # read BEFORE overwriting
    halo_ref[...] = z3[:, ts - 3:ts, :]        # save for the next chunk

    t_idx = lax.broadcasted_iota(jnp.int32, (tb, ts, C), 1)

    def pick(q, col):
        # Boundary row q in [0, 6): rows 0-2 come from the halo (previous
        # chunk), rows 3-5 are rows 0-2 of this chunk.  Returns [tb, 1, C].
        src = h if q < 3 else z3
        r = q if q < 3 else q - 3
        return src[:, r:r + 1, col * C:(col + 1) * C]

    def conv_chunk_max(col, k, max_ref_k):
        # (a) Windows fully inside this chunk: tap j shifted with an XLU
        # sublane roll instead of materializing sublane-offset slice copies.
        acc = z2[:, col * C:(col + 1) * C]
        for j in range(1, k):
            acc = acc + pltpu.roll(z2[:, (col + j) * C:(col + j + 1) * C],
                                   shift=rows - j, axis=0)
        acc = acc.reshape(tb, ts, C)
        # Rows t > ts-k picked up wrapped (next-batch / next-chunk) data; those
        # windows are either handled as the NEXT chunk's boundary windows or
        # are invalid end-of-sequence windows -> mask before the max.
        acc = jnp.where(t_idx <= ts - k, acc, _NEG)
        m = jnp.max(acc, axis=1)                                  # [tb, C]
        # (b) The k-1 windows straddling the previous chunk boundary, built
        # from the 3-row halo (at t == 0 the halo is -1e30 so they never win).
        best = None
        for p in range(3):
            s = pick(p, col)
            for j in range(1, k):
                s = s + pick(p + j, col + j)
            best = s if best is None else jnp.maximum(best, s)
        m = jnp.maximum(m, best.reshape(tb, C))
        # Running max across time chunks.
        max_ref_k[...] = jnp.maximum(max_ref_k[...], m)

    conv_chunk_max(0, 2, max1_ref)   # conv1: columns [0C, 2C)
    conv_chunk_max(2, 3, max2_ref)   # conv2: columns [2C, 5C)
    conv_chunk_max(5, 4, max3_ref)   # conv3: columns [5C, 9C)

    @pl.when(t == nt - 1)
    def _finalize():
        # Conv bias is constant over time -> add AFTER the max (equivalent).
        # Dropout = identity at inference.
        f1 = (max1_ref[...] + b1_ref[...]).astype(jnp.bfloat16)
        f2 = (max2_ref[...] + b2_ref[...]).astype(jnp.bfloat16)
        f3 = (max3_ref[...] + b3_ref[...]).astype(jnp.bfloat16)
        # Classifier on [f1 | f2 | f3] via three partial matmuls against
        # sublane-aligned row-slices of Wc (avoids an explicit lane concat).
        logits = (jnp.dot(f1, wc_ref[0:C, :], preferred_element_type=jnp.float32)
                  + jnp.dot(f2, wc_ref[C:2 * C, :],
                            preferred_element_type=jnp.float32)
                  + jnp.dot(f3, wc_ref[2 * C:3 * C, :],
                            preferred_element_type=jnp.float32)
                  + bc_ref[...])                                  # [tb, nl_pad]
        out_ref[0] = logits.astype(out_ref.dtype)


def bert_cnn_forward(x, params, *, tb=None, ts=None):
    """x: [B, S, H] float32 (bert_out).  Returns logits [B, num_labels]."""
    B, S, H = x.shape
    C = params["b1"].shape[-1]
    assert 3 * C == H, "BertCNN assumes hidden_size % 3 == 0 (3*C == H)"
    assert S % 8 == 0, "seq length assumed sublane-aligned (true for BERT: 512)"
    num_labels = params["bc"].shape[-1]

    # Batch tile: amortize per-grid-step overhead and batch the classifier
    # matmul while keeping >= 2 parallel grid steps for v7x's two TensorCores.
    if tb is None:
        tb = max(1, min(8, B // 2))
    G = (B + tb - 1) // tb
    Bp = G * tb
    if Bp != B:
        x = jnp.pad(x, ((0, Bp - B), (0, 0), (0, 0)))

    # Time chunk: keep the f32 conv intermediate small (<= ~10 MB at BERT
    # sizes) and let BlockSpec pipelining stream x chunk by chunk.
    if ts is None:
        ts = S
        for cand in (128, 64, 32, 16, 8):
            if S % cand == 0:
                ts = cand
                break
    assert S % ts == 0 and ts % 8 == 0
    T = S // ts

    # Fuse the 9 conv tap-matrices into one wide [H, 9C] weight (host-side,
    # one-time).  Column layout: [w1_0 w1_1 | w2_0 w2_1 w2_2 | w3_0..w3_3].
    w_all = jnp.concatenate(
        [params["w1"].transpose(1, 0, 2).reshape(H, 2 * C),
         params["w2"].transpose(1, 0, 2).reshape(H, 3 * C),
         params["w3"].transpose(1, 0, 2).reshape(H, 4 * C)],
        axis=1).astype(jnp.bfloat16)

    # Lane-dense classifier output: pad num_labels up to a multiple of 128.
    nl_pad = 128 * ((num_labels + 127) // 128)
    wc_pad = jnp.zeros((3 * C, nl_pad), jnp.bfloat16).at[:, :num_labels].set(
        params["wc"].astype(jnp.bfloat16))
    bc_pad = jnp.zeros((1, nl_pad), jnp.float32).at[:, :num_labels].set(
        params["bc"])

    kernel = functools.partial(bert_cnn_kernel, tb=tb, ts=ts, channels=C)

    # Rough per-step VMEM footprint; only request an explicit limit when the
    # defaults (16 MiB v5e / 32 MiB v6e,v7x) could be too small.
    vmem_est = (2 * tb * ts * H * 4          # x blocks (f32, double buffered)
                + 2 * H * 9 * C * 2          # fused conv weight (bf16, x2)
                + 2 * 3 * C * nl_pad * 2     # classifier weight (bf16, x2)
                + tb * ts * 9 * C * 4        # z (f32, transient)
                + 7 * tb * ts * C * 4        # rolled / masked temporaries
                + tb * 8 * 9 * C * 4         # halo scratch (sublane padded)
                + 4 * tb * max(C, 128) * 4)  # running-max scratch + out
    vmem_limit = None
    if vmem_est > 16 * 1024 * 1024:
        vmem_limit = max(32 * 1024 * 1024,
                         min(int(vmem_est * 1.5), 96 * 1024 * 1024))

    flops = 2 * Bp * S * H * (9 * C) + 2 * Bp * (3 * C) * nl_pad
    bytes_accessed = (Bp * S * H * 4 + w_all.size * 2 + wc_pad.size * 2
                      + Bp * nl_pad * 4)

    out = pl.pallas_call(
        kernel,
        out_shape=jax.ShapeDtypeStruct((G, tb, nl_pad), jnp.float32),
        grid=(G, T),
        in_specs=[
            pl.BlockSpec((tb, ts, H), lambda i, t: (i, t, 0)),     # x (streamed)
            pl.BlockSpec((H, 9 * C), lambda i, t: (0, 0)),         # fused conv W
            pl.BlockSpec((1, C), lambda i, t: (0, 0)),             # conv1 bias
            pl.BlockSpec((1, C), lambda i, t: (0, 0)),             # conv2 bias
            pl.BlockSpec((1, C), lambda i, t: (0, 0)),             # conv3 bias
            pl.BlockSpec((3 * C, nl_pad), lambda i, t: (0, 0)),    # classifier W
            pl.BlockSpec((1, nl_pad), lambda i, t: (0, 0)),        # classifier b
        ],
        out_specs=pl.BlockSpec((1, tb, nl_pad), lambda i, t: (i, 0, 0)),
        scratch_shapes=[
            pltpu.VMEM((tb, 3, 9 * C), jnp.float32),   # z halo (last 3 rows)
            pltpu.VMEM((tb, C), jnp.float32),          # running max conv1
            pltpu.VMEM((tb, C), jnp.float32),          # running max conv2
            pltpu.VMEM((tb, C), jnp.float32),          # running max conv3
        ],
        compiler_params=pltpu.CompilerParams(
            dimension_semantics=("parallel", "arbitrary"),
            vmem_limit_bytes=vmem_limit),
        cost_estimate=pl.CostEstimate(flops=flops, transcendentals=0,
                                      bytes_accessed=bytes_accessed),
    )(x, w_all, params["b1"], params["b2"], params["b3"], wc_pad, bc_pad)

    return out.reshape(Bp, nl_pad)[:B, :num_labels]


def init_params(key, hidden_size, num_labels):
    """Deterministic parameter init (mirrors init_bert_weights: N(0, 0.02))."""
    assert hidden_size % 3 == 0
    C = hidden_size // 3
    ks = jax.random.split(key, 4)
    std = 0.02
    # PyTorch conv weight is [C, 1, k, H]; stored here as [k, H, C] (matmul form).
    w1 = jax.random.normal(ks[0], (2, hidden_size, C), jnp.float32) * std
    w2 = jax.random.normal(ks[1], (3, hidden_size, C), jnp.float32) * std
    w3 = jax.random.normal(ks[2], (4, hidden_size, C), jnp.float32) * std
    # PyTorch Linear weight is [num_labels, H]; stored transposed [H, num_labels].
    wc = jax.random.normal(ks[3], (3 * C, num_labels), jnp.float32) * std
    return {
        "w1": w1, "b1": jnp.zeros((1, C), jnp.float32),
        "w2": w2, "b2": jnp.zeros((1, C), jnp.float32),
        "w3": w3, "b3": jnp.zeros((1, C), jnp.float32),
        "wc": wc, "bc": jnp.zeros((1, num_labels), jnp.float32),
    }


def reference_forward(x, params):
    """Pure-JAX reference with the same bf16-at-MXU numerics (sanity check)."""
    B, S, H = x.shape
    C = params["b1"].shape[-1]
    xb = x.astype(jnp.bfloat16).astype(jnp.float32)

    def conv_max(w, b, k):
        wb = w.astype(jnp.bfloat16).astype(jnp.float32)
        L = S - k + 1
        acc = jnp.zeros((B, L, C), jnp.float32)
        for j in range(k):
            acc = acc + jnp.einsum("bth,hc->btc", xb[:, j:j + L, :], wb[j])
        return jnp.max(acc, axis=1) + b                    # [B, C]

    f1 = conv_max(params["w1"], params["b1"], 2)
    f2 = conv_max(params["w2"], params["b2"], 3)
    f3 = conv_max(params["w3"], params["b3"], 4)
    feat = jnp.concatenate([f1, f2, f3], axis=1)           # [B, 3C]
    featb = feat.astype(jnp.bfloat16).astype(jnp.float32)
    wcb = params["wc"].astype(jnp.bfloat16).astype(jnp.float32)
    return featb @ wcb + params["bc"]                      # [B, num_labels]


if __name__ == "__main__":
    B, S, H = 8, 16, 48           # batch, max_position_embeddings, hidden_size
    num_labels = 16               # small stand-in for 103
    key = jax.random.PRNGKey(0)
    kx, kp = jax.random.split(key)

    # bert_out stand-in (the pretrained encoder is out of scope for the kernel)
    x = jax.random.normal(kx, (B, S, H), jnp.float32)
    params = init_params(kp, H, num_labels)

    # ts=8 forces two time chunks -> exercises the halo / running-max path.
    logits = jax.block_until_ready(bert_cnn_forward(x, params, ts=8))
    ref = reference_forward(x, params)
    assert logits.shape == (B, num_labels)
    max_err = float(jnp.max(jnp.abs(logits - ref)))
    assert jnp.allclose(logits, ref, atol=2e-3, rtol=2e-3), \
        f"mismatch vs reference (max abs err {max_err})"
    print("KERNEL_OK")
</pallas_src>

<mosaic_0001>
module attributes {stable_mosaic.version = 11 : i64} {
  func.func @bert_cnn_kernel(%arg0: i32, %arg1: i32, %arg2: memref<4x8x48xf32, #tpu.memory_space<vmem>>, %arg3: memref<48x144xbf16, #tpu.memory_space<vmem>>, %arg4: memref<1x16xf32, #tpu.memory_space<vmem>>, %arg5: memref<1x16xf32, #tpu.memory_space<vmem>>, %arg6: memref<1x16xf32, #tpu.memory_space<vmem>>, %arg7: memref<48x128xbf16, #tpu.memory_space<vmem>>, %arg8: memref<1x128xf32, #tpu.memory_space<vmem>>, %arg9: memref<1x4x128xf32, #tpu.memory_space<vmem>>, %arg10: memref<4x3x144xf32, #tpu.memory_space<vmem>>, %arg11: memref<4x16xf32, #tpu.memory_space<vmem>>, %arg12: memref<4x16xf32, #tpu.memory_space<vmem>>, %arg13: memref<4x16xf32, #tpu.memory_space<vmem>>) attributes {dimension_semantics = [#tpu.dimension_semantics<parallel>, #tpu.dimension_semantics<arbitrary>], iteration_bounds = array<i64: 2, 2>, scalar_prefetch = 0 : i64, scratch_operands = 4 : i64, tpu.core_type = #tpu.core_type<tc>, window_params = [{transform_indices = @transform_0, window_bounds = array<i64: 4, 8, 48>}, {pipeline_mode = #tpu.pipeline_mode<synchronous>, transform_indices = @transform_1, window_bounds = array<i64: 48, 144>}, {pipeline_mode = #tpu.pipeline_mode<synchronous>, transform_indices = @transform_2, window_bounds = array<i64: 1, 16>}, {pipeline_mode = #tpu.pipeline_mode<synchronous>, transform_indices = @transform_3, window_bounds = array<i64: 1, 16>}, {pipeline_mode = #tpu.pipeline_mode<synchronous>, transform_indices = @transform_4, window_bounds = array<i64: 1, 16>}, {pipeline_mode = #tpu.pipeline_mode<synchronous>, transform_indices = @transform_5, window_bounds = array<i64: 48, 128>}, {pipeline_mode = #tpu.pipeline_mode<synchronous>, transform_indices = @transform_6, window_bounds = array<i64: 1, 128>}, {transform_indices = @transform_7, window_bounds = array<i64: 1, 4, 128>}]} {
    %c0_i32 = arith.constant 0 : i32
    %0 = arith.cmpi eq, %arg1, %c0_i32 : i32
    %1 = arith.extui %0 : i1 to i32
    %c0_i32_0 = arith.constant 0 : i32
    %2 = arith.cmpi ne, %1, %c0_i32_0 : i32
    scf.if %2 {
      %cst_33 = arith.constant -1.000000e+30 : f32
      %121 = vector.broadcast %cst_33 : f32 to vector<4x3x144xf32>
      %c0_34 = arith.constant 0 : index
      %c0_35 = arith.constant 0 : index
      %c0_36 = arith.constant 0 : index
      %122 = vector.load %arg10[%c0_34, %c0_35, %c0_36] : memref<4x3x144xf32, #tpu.memory_space<vmem>>, vector<4x3x144xf32>
      tpu.vector_store %arg10[%c0_34, %c0_35, %c0_36], %121 {strides = array<i32>} : memref<4x3x144xf32, #tpu.memory_space<vmem>>, vector<4x3x144xf32>,
      %cst_37 = arith.constant -1.000000e+30 : f32
      %123 = vector.broadcast %cst_37 : f32 to vector<4x16xf32>
      %c0_38 = arith.constant 0 : index
      %c0_39 = arith.constant 0 : index
      %124 = vector.load %arg11[%c0_38, %c0_39] : memref<4x16xf32, #tpu.memory_space<vmem>>, vector<4x16xf32>
      tpu.vector_store %arg11[%c0_38, %c0_39], %123 {strides = array<i32>} : memref<4x16xf32, #tpu.memory_space<vmem>>, vector<4x16xf32>,
      %cst_40 = arith.constant -1.000000e+30 : f32
      %125 = vector.broadcast %cst_40 : f32 to vector<4x16xf32>
      %c0_41 = arith.constant 0 : index
      %c0_42 = arith.constant 0 : index
      %126 = vector.load %arg12[%c0_41, %c0_42] : memref<4x16xf32, #tpu.memory_space<vmem>>, vector<4x16xf32>
      tpu.vector_store %arg12[%c0_41, %c0_42], %125 {strides = array<i32>} : memref<4x16xf32, #tpu.memory_space<vmem>>, vector<4x16xf32>,
      %cst_43 = arith.constant -1.000000e+30 : f32
      %127 = vector.broadcast %cst_43 : f32 to vector<4x16xf32>
      %c0_44 = arith.constant 0 : index
      %c0_45 = arith.constant 0 : index
      %128 = vector.load %arg13[%c0_44, %c0_45] : memref<4x16xf32, #tpu.memory_space<vmem>>, vector<4x16xf32>
      tpu.vector_store %arg13[%c0_44, %c0_45], %127 {strides = array<i32>} : memref<4x16xf32, #tpu.memory_space<vmem>>, vector<4x16xf32>,
    } else {
    }
    %c0 = arith.constant 0 : index
    %c0_1 = arith.constant 0 : index
    %c0_2 = arith.constant 0 : index
    %3 = vector.load %arg2[%c0, %c0_1, %c0_2] : memref<4x8x48xf32, #tpu.memory_space<vmem>>, vector<4x8x48xf32>
    %4 = vector.shape_cast %3 : vector<4x8x48xf32> to vector<32x48xf32>
    %5 = arith.truncf %4 : vector<32x48xf32> to vector<32x48xbf16>
    %c0_3 = arith.constant 0 : index
    %c0_4 = arith.constant 0 : index
    %6 = vector.load %arg3[%c0_3, %c0_4] : memref<48x144xbf16, #tpu.memory_space<vmem>>, vector<48x144xbf16>
    %cst = arith.constant dense<0.000000e+00> : vector<32x144xf32>
    %7 = tpu.matmul %5, %6, %cst {dimension_numbers = #tpu.dot_dimension_numbers<[1], [0], [0], [1], [0, 0, 1, 1], [], []>} : vector<32x48xbf16>, vector<48x144xbf16>, vector<32x144xf32> -> vector<32x144xf32>
    %8 = vector.shape_cast %7 : vector<32x144xf32> to vector<4x8x144xf32>
    %c0_5 = arith.constant 0 : index
    %c0_6 = arith.constant 0 : index
    %c0_7 = arith.constant 0 : index
    %9 = vector.load %arg10[%c0_5, %c0_6, %c0_7] : memref<4x3x144xf32, #tpu.memory_space<vmem>>, vector<4x3x144xf32>
    %10 = vector.extract_strided_slice %8 {offsets = [0, 5, 0], sizes = [4, 3, 144], strides = [1, 1, 1]} : vector<4x8x144xf32> to vector<4x3x144xf32>
    %c0_8 = arith.constant 0 : index
    %c0_9 = arith.constant 0 : index
    %c0_10 = arith.constant 0 : index
    %11 = vector.load %arg10[%c0_8, %c0_9, %c0_10] : memref<4x3x144xf32, #tpu.memory_space<vmem>>, vector<4x3x144xf32>
    tpu.vector_store %arg10[%c0_8, %c0_9, %c0_10], %10 {strides = array<i32>} : memref<4x3x144xf32, #tpu.memory_space<vmem>>, vector<4x3x144xf32>,
    %12 = tpu.iota {dimensions = array<i32: 1>} : vector<4x8x16xi32>
    %13 = vector.extract_strided_slice %7 {offsets = [0, 0], sizes = [32, 16], strides = [1, 1]} : vector<32x144xf32> to vector<32x16xf32>
    %14 = vector.extract_strided_slice %7 {offsets = [0, 16], sizes = [32, 16], strides = [1, 1]} : vector<32x144xf32> to vector<32x16xf32>
    %c31_i32 = arith.constant 31 : i32
    %15 = tpu.dynamic_rotate %14 by %c31_i32 dim 0 : vector<32x16xf32>, i32 -> vector<32x16xf32>
    %16 = arith.addf %13, %15 : vector<32x16xf32>
    %17 = vector.shape_cast %16 : vector<32x16xf32> to vector<4x8x16xf32>
    %c6_i32 = arith.constant 6 : i32
    %18 = vector.broadcast %c6_i32 : i32 to vector<4x8x16xi32>
    %19 = arith.cmpi sle, %12, %18 : vector<4x8x16xi32>
    %cst_11 = arith.constant -1.000000e+30 : f32
    %20 = vector.broadcast %cst_11 : f32 to vector<4x8x16xf32>
    %21 = arith.select %19, %17, %20 : vector<4x8x16xi1>, vector<4x8x16xf32>
    %cst_12 = arith.constant dense<0xFF800000> : vector<4x16xf32>
    %22 = vector.multi_reduction <maximumf>, %21, %cst_12 [1] : vector<4x8x16xf32> to vector<4x16xf32>
    %23 = vector.extract_strided_slice %9 {offsets = [0, 0, 0], sizes = [4, 1, 16], strides = [1, 1, 1]} : vector<4x3x144xf32> to vector<4x1x16xf32>
    %24 = vector.extract_strided_slice %9 {offsets = [0, 1, 16], sizes = [4, 1, 16], strides = [1, 1, 1]} : vector<4x3x144xf32> to vector<4x1x16xf32>
    %25 = arith.addf %23, %24 : vector<4x1x16xf32>
    %26 = vector.extract_strided_slice %9 {offsets = [0, 1, 0], sizes = [4, 1, 16], strides = [1, 1, 1]} : vector<4x3x144xf32> to vector<4x1x16xf32>
    %27 = vector.extract_strided_slice %9 {offsets = [0, 2, 16], sizes = [4, 1, 16], strides = [1, 1, 1]} : vector<4x3x144xf32> to vector<4x1x16xf32>
    %28 = arith.addf %26, %27 : vector<4x1x16xf32>
    %29 = arith.maximumf %25, %28 : vector<4x1x16xf32>
    %30 = vector.extract_strided_slice %9 {offsets = [0, 2, 0], sizes = [4, 1, 16], strides = [1, 1, 1]} : vector<4x3x144xf32> to vector<4x1x16xf32>
    %31 = vector.extract_strided_slice %8 {offsets = [0, 0, 16], sizes = [4, 1, 16], strides = [1, 1, 1]} : vector<4x8x144xf32> to vector<4x1x16xf32>
    %32 = arith.addf %30, %31 : vector<4x1x16xf32>
    %33 = arith.maximumf %29, %32 : vector<4x1x16xf32>
    %34 = vector.shape_cast %33 : vector<4x1x16xf32> to vector<4x16xf32>
    %35 = arith.maximumf %22, %34 : vector<4x16xf32>
    %c0_13 = arith.constant 0 : index
    %c0_14 = arith.constant 0 : index
    %36 = vector.load %arg11[%c0_13, %c0_14] : memref<4x16xf32, #tpu.memory_space<vmem>>, vector<4x16xf32>
    %37 = arith.maximumf %36, %35 : vector<4x16xf32>
    %c0_15 = arith.constant 0 : index
    %c0_16 = arith.constant 0 : index
    %38 = vector.load %arg11[%c0_15, %c0_16] : memref<4x16xf32, #tpu.memory_space<vmem>>, vector<4x16xf32>
    tpu.vector_store %arg11[%c0_15, %c0_16], %37 {strides = array<i32>} : memref<4x16xf32, #tpu.memory_space<vmem>>, vector<4x16xf32>,
    %39 = vector.extract_strided_slice %7 {offsets = [0, 32], sizes = [32, 16], strides = [1, 1]} : vector<32x144xf32> to vector<32x16xf32>
    %40 = vector.extract_strided_slice %7 {offsets = [0, 48], sizes = [32, 16], strides = [1, 1]} : vector<32x144xf32> to vector<32x16xf32>
    %c31_i32_17 = arith.constant 31 : i32
    %41 = tpu.dynamic_rotate %40 by %c31_i32_17 dim 0 : vector<32x16xf32>, i32 -> vector<32x16xf32>
    %42 = arith.addf %39, %41 : vector<32x16xf32>
    %43 = vector.extract_strided_slice %7 {offsets = [0, 64], sizes = [32, 16], strides = [1, 1]} : vector<32x144xf32> to vector<32x16xf32>
    %c30_i32 = arith.constant 30 : i32
    %44 = tpu.dynamic_rotate %43 by %c30_i32 dim 0 : vector<32x16xf32>, i32 -> vector<32x16xf32>
    %45 = arith.addf %42, %44 : vector<32x16xf32>
    %46 = vector.shape_cast %45 : vector<32x16xf32> to vector<4x8x16xf32>
    %c5_i32 = arith.constant 5 : i32
    %47 = vector.broadcast %c5_i32 : i32 to vector<4x8x16xi32>
    %48 = arith.cmpi sle, %12, %47 : vector<4x8x16xi32>
    %cst_18 = arith.constant -1.000000e+30 : f32
    %49 = vector.broadcast %cst_18 : f32 to vector<4x8x16xf32>
    %50 = arith.select %48, %46, %49 : vector<4x8x16xi1>, vector<4x8x16xf32>
    %cst_19 = arith.constant dense<0xFF800000> : vector<4x16xf32>
    %51 = vector.multi_reduction <maximumf>, %50, %cst_19 [1] : vector<4x8x16xf32> to vector<4x16xf32>
    %52 = vector.extract_strided_slice %9 {offsets = [0, 0, 32], sizes = [4, 1, 16], strides = [1, 1, 1]} : vector<4x3x144xf32> to vector<4x1x16xf32>
    %53 = vector.extract_strided_slice %9 {offsets = [0, 1, 48], sizes = [4, 1, 16], strides = [1, 1, 1]} : vector<4x3x144xf32> to vector<4x1x16xf32>
    %54 = arith.addf %52, %53 : vector<4x1x16xf32>
    %55 = vector.extract_strided_slice %9 {offsets = [0, 2, 64], sizes = [4, 1, 16], strides = [1, 1, 1]} : vector<4x3x144xf32> to vector<4x1x16xf32>
    %56 = arith.addf %54, %55 : vector<4x1x16xf32>
    %57 = vector.extract_strided_slice %9 {offsets = [0, 1, 32], sizes = [4, 1, 16], strides = [1, 1, 1]} : vector<4x3x144xf32> to vector<4x1x16xf32>
    %58 = vector.extract_strided_slice %9 {offsets = [0, 2, 48], sizes = [4, 1, 16], strides = [1, 1, 1]} : vector<4x3x144xf32> to vector<4x1x16xf32>
    %59 = arith.addf %57, %58 : vector<4x1x16xf32>
    %60 = vector.extract_strided_slice %8 {offsets = [0, 0, 64], sizes = [4, 1, 16], strides = [1, 1, 1]} : vector<4x8x144xf32> to vector<4x1x16xf32>
    %61 = arith.addf %59, %60 : vector<4x1x16xf32>
    %62 = arith.maximumf %56, %61 : vector<4x1x16xf32>
    %63 = vector.extract_strided_slice %9 {offsets = [0, 2, 32], sizes = [4, 1, 16], strides = [1, 1, 1]} : vector<4x3x144xf32> to vector<4x1x16xf32>
    %64 = vector.extract_strided_slice %8 {offsets = [0, 0, 48], sizes = [4, 1, 16], strides = [1, 1, 1]} : vector<4x8x144xf32> to vector<4x1x16xf32>
    %65 = arith.addf %63, %64 : vector<4x1x16xf32>
    %66 = vector.extract_strided_slice %8 {offsets = [0, 1, 64], sizes = [4, 1, 16], strides = [1, 1, 1]} : vector<4x8x144xf32> to vector<4x1x16xf32>
    %67 = arith.addf %65, %66 : vector<4x1x16xf32>
    %68 = arith.maximumf %62, %67 : vector<4x1x16xf32>
    %69 = vector.shape_cast %68 : vector<4x1x16xf32> to vector<4x16xf32>
    %70 = arith.maximumf %51, %69 : vector<4x16xf32>
    %c0_20 = arith.constant 0 : index
    %c0_21 = arith.constant 0 : index
    %71 = vector.load %arg12[%c0_20, %c0_21] : memref<4x16xf32, #tpu.memory_space<vmem>>, vector<4x16xf32>
    %72 = arith.maximumf %71, %70 : vector<4x16xf32>
    %c0_22 = arith.constant 0 : index
    %c0_23 = arith.constant 0 : index
    %73 = vector.load %arg12[%c0_22, %c0_23] : memref<4x16xf32, #tpu.memory_space<vmem>>, vector<4x16xf32>
    tpu.vector_store %arg12[%c0_22, %c0_23], %72 {strides = array<i32>} : memref<4x16xf32, #tpu.memory_space<vmem>>, vector<4x16xf32>,
    %74 = vector.extract_strided_slice %7 {offsets = [0, 80], sizes = [32, 16], strides = [1, 1]} : vector<32x144xf32> to vector<32x16xf32>
    %75 = vector.extract_strided_slice %7 {offsets = [0, 96], sizes = [32, 16], strides = [1, 1]} : vector<32x144xf32> to vector<32x16xf32>
    %c31_i32_24 = arith.constant 31 : i32
    %76 = tpu.dynamic_rotate %75 by %c31_i32_24 dim 0 : vector<32x16xf32>, i32 -> vector<32x16xf32>
    %77 = arith.addf %74, %76 : vector<32x16xf32>
    %78 = vector.extract_strided_slice %7 {offsets = [0, 112], sizes = [32, 16], strides = [1, 1]} : vector<32x144xf32> to vector<32x16xf32>
    %c30_i32_25 = arith.constant 30 : i32
    %79 = tpu.dynamic_rotate %78 by %c30_i32_25 dim 0 : vector<32x16xf32>, i32 -> vector<32x16xf32>
    %80 = arith.addf %77, %79 : vector<32x16xf32>
    %81 = vector.extract_strided_slice %7 {offsets = [0, 128], sizes = [32, 16], strides = [1, 1]} : vector<32x144xf32> to vector<32x16xf32>
    %c29_i32 = arith.constant 29 : i32
    %82 = tpu.dynamic_rotate %81 by %c29_i32 dim 0 : vector<32x16xf32>, i32 -> vector<32x16xf32>
    %83 = arith.addf %80, %82 : vector<32x16xf32>
    %84 = vector.shape_cast %83 : vector<32x16xf32> to vector<4x8x16xf32>
    %c4_i32 = arith.constant 4 : i32
    %85 = vector.broadcast %c4_i32 : i32 to vector<4x8x16xi32>
    %86 = arith.cmpi sle, %12, %85 : vector<4x8x16xi32>
    %cst_26 = arith.constant -1.000000e+30 : f32
    %87 = vector.broadcast %cst_26 : f32 to vector<4x8x16xf32>
    %88 = arith.select %86, %84, %87 : vector<4x8x16xi1>, vector<4x8x16xf32>
    %cst_27 = arith.constant dense<0xFF800000> : vector<4x16xf32>
    %89 = vector.multi_reduction <maximumf>, %88, %cst_27 [1] : vector<4x8x16xf32> to vector<4x16xf32>
    %90 = vector.extract_strided_slice %9 {offsets = [0, 0, 80], sizes = [4, 1, 16], strides = [1, 1, 1]} : vector<4x3x144xf32> to vector<4x1x16xf32>
    %91 = vector.extract_strided_slice %9 {offsets = [0, 1, 96], sizes = [4, 1, 16], strides = [1, 1, 1]} : vector<4x3x144xf32> to vector<4x1x16xf32>
    %92 = arith.addf %90, %91 : vector<4x1x16xf32>
    %93 = vector.extract_strided_slice %9 {offsets = [0, 2, 112], sizes = [4, 1, 16], strides = [1, 1, 1]} : vector<4x3x144xf32> to vector<4x1x16xf32>
    %94 = arith.addf %92, %93 : vector<4x1x16xf32>
    %95 = vector.extract_strided_slice %8 {offsets = [0, 0, 128], sizes = [4, 1, 16], strides = [1, 1, 1]} : vector<4x8x144xf32> to vector<4x1x16xf32>
    %96 = arith.addf %94, %95 : vector<4x1x16xf32>
    %97 = vector.extract_strided_slice %9 {offsets = [0, 1, 80], sizes = [4, 1, 16], strides = [1, 1, 1]} : vector<4x3x144xf32> to vector<4x1x16xf32>
    %98 = vector.extract_strided_slice %9 {offsets = [0, 2, 96], sizes = [4, 1, 16], strides = [1, 1, 1]} : vector<4x3x144xf32> to vector<4x1x16xf32>
    %99 = arith.addf %97, %98 : vector<4x1x16xf32>
    %100 = vector.extract_strided_slice %8 {offsets = [0, 0, 112], sizes = [4, 1, 16], strides = [1, 1, 1]} : vector<4x8x144xf32> to vector<4x1x16xf32>
    %101 = arith.addf %99, %100 : vector<4x1x16xf32>
    %102 = vector.extract_strided_slice %8 {offsets = [0, 1, 128], sizes = [4, 1, 16], strides = [1, 1, 1]} : vector<4x8x144xf32> to vector<4x1x16xf32>
    %103 = arith.addf %101, %102 : vector<4x1x16xf32>
    %104 = arith.maximumf %96, %103 : vector<4x1x16xf32>
    %105 = vector.extract_strided_slice %9 {offsets = [0, 2, 80], sizes = [4, 1, 16], strides = [1, 1, 1]} : vector<4x3x144xf32> to vector<4x1x16xf32>
    %106 = vector.extract_strided_slice %8 {offsets = [0, 0, 96], sizes = [4, 1, 16], strides = [1, 1, 1]} : vector<4x8x144xf32> to vector<4x1x16xf32>
    %107 = arith.addf %105, %106 : vector<4x1x16xf32>
    %108 = vector.extract_strided_slice %8 {offsets = [0, 1, 112], sizes = [4, 1, 16], strides = [1, 1, 1]} : vector<4x8x144xf32> to vector<4x1x16xf32>
    %109 = arith.addf %107, %108 : vector<4x1x16xf32>
    %110 = vector.extract_strided_slice %8 {offsets = [0, 2, 128], sizes = [4, 1, 16], strides = [1, 1, 1]} : vector<4x8x144xf32> to vector<4x1x16xf32>
    %111 = arith.addf %109, %110 : vector<4x1x16xf32>
    %112 = arith.maximumf %104, %111 : vector<4x1x16xf32>
    %113 = vector.shape_cast %112 : vector<4x1x16xf32> to vector<4x16xf32>
    %114 = arith.maximumf %89, %113 : vector<4x16xf32>
    %c0_28 = arith.constant 0 : index
    %c0_29 = arith.constant 0 : index
    %115 = vector.load %arg13[%c0_28, %c0_29] : memref<4x16xf32, #tpu.memory_space<vmem>>, vector<4x16xf32>
    %116 = arith.maximumf %115, %114 : vector<4x16xf32>
    %c0_30 = arith.constant 0 : index
    %c0_31 = arith.constant 0 : index
    %117 = vector.load %arg13[%c0_30, %c0_31] : memref<4x16xf32, #tpu.memory_space<vmem>>, vector<4x16xf32>
    tpu.vector_store %arg13[%c0_30, %c0_31], %116 {strides = array<i32>} : memref<4x16xf32, #tpu.memory_space<vmem>>, vector<4x16xf32>,
    %c1_i32 = arith.constant 1 : i32
    %118 = arith.cmpi eq, %arg1, %c1_i32 : i32
    %119 = arith.extui %118 : i1 to i32
    %c0_i32_32 = arith.constant 0 : i32
    %120 = arith.cmpi ne, %119, %c0_i32_32 : i32
    scf.if %120 {
      %c0_33 = arith.constant 0 : index
      %c0_34 = arith.constant 0 : index
      %121 = vector.load %arg11[%c0_33, %c0_34] : memref<4x16xf32, #tpu.memory_space<vmem>>, vector<4x16xf32>
      %c0_35 = arith.constant 0 : index
      %c0_36 = arith.constant 0 : index
      %122 = vector.load %arg4[%c0_35, %c0_36] : memref<1x16xf32, #tpu.memory_space<vmem>>, vector<1x16xf32>
      %123 = vector.broadcast %122 : vector<1x16xf32> to vector<4x16xf32>
      %124 = arith.addf %121, %123 : vector<4x16xf32>
      %125 = arith.truncf %124 : vector<4x16xf32> to vector<4x16xbf16>
      %c0_37 = arith.constant 0 : index
      %c0_38 = arith.constant 0 : index
      %126 = vector.load %arg12[%c0_37, %c0_38] : memref<4x16xf32, #tpu.memory_space<vmem>>, vector<4x16xf32>
      %c0_39 = arith.constant 0 : index
      %c0_40 = arith.constant 0 : index
      %127 = vector.load %arg5[%c0_39, %c0_40] : memref<1x16xf32, #tpu.memory_space<vmem>>, vector<1x16xf32>
      %128 = vector.broadcast %127 : vector<1x16xf32> to vector<4x16xf32>
      %129 = arith.addf %126, %128 : vector<4x16xf32>
      %130 = arith.truncf %129 : vector<4x16xf32> to vector<4x16xbf16>
      %c0_41 = arith.constant 0 : index
      %c0_42 = arith.constant 0 : index
      %131 = vector.load %arg13[%c0_41, %c0_42] : memref<4x16xf32, #tpu.memory_space<vmem>>, vector<4x16xf32>
      %c0_43 = arith.constant 0 : index
      %c0_44 = arith.constant 0 : index
      %132 = vector.load %arg6[%c0_43, %c0_44] : memref<1x16xf32, #tpu.memory_space<vmem>>, vector<1x16xf32>
      %133 = vector.broadcast %132 : vector<1x16xf32> to vector<4x16xf32>
      %134 = arith.addf %131, %133 : vector<4x16xf32>
      %135 = arith.truncf %134 : vector<4x16xf32> to vector<4x16xbf16>
      %c0_45 = arith.constant 0 : index
      %c0_46 = arith.constant 0 : index
      %136 = vector.load %arg7[%c0_45, %c0_46] : memref<48x128xbf16, #tpu.memory_space<vmem>>, vector<16x128xbf16>
      %cst_47 = arith.constant dense<0.000000e+00> : vector<4x128xf32>
      %137 = tpu.matmul %125, %136, %cst_47 {dimension_numbers = #tpu.dot_dimension_numbers<[1], [0], [0], [1], [0, 0, 1, 1], [], []>} : vector<4x16xbf16>, vector<16x128xbf16>, vector<4x128xf32> -> vector<4x128xf32>
      %c16 = arith.constant 16 : index
      %c0_48 = arith.constant 0 : index
      %138 = vector.load %arg7[%c16, %c0_48] : memref<48x128xbf16, #tpu.memory_space<vmem>>, vector<16x128xbf16>
      %cst_49 = arith.constant dense<0.000000e+00> : vector<4x128xf32>
      %139 = tpu.matmul %130, %138, %cst_49 {dimension_numbers = #tpu.dot_dimension_numbers<[1], [0], [0], [1], [0, 0, 1, 1], [], []>} : vector<4x16xbf16>, vector<16x128xbf16>, vector<4x128xf32> -> vector<4x128xf32>
      %140 = arith.addf %137, %139 : vector<4x128xf32>
      %c32 = arith.constant 32 : index
      %c0_50 = arith.constant 0 : index
      %141 = vector.load %arg7[%c32, %c0_50] : memref<48x128xbf16, #tpu.memory_space<vmem>>, vector<16x128xbf16>
      %cst_51 = arith.constant dense<0.000000e+00> : vector<4x128xf32>
      %142 = tpu.matmul %135, %141, %cst_51 {dimension_numbers = #tpu.dot_dimension_numbers<[1], [0], [0], [1], [0, 0, 1, 1], [], []>} : vector<4x16xbf16>, vector<16x128xbf16>, vector<4x128xf32> -> vector<4x128xf32>
      %143 = arith.addf %140, %142 : vector<4x128xf32>
      %c0_52 = arith.constant 0 : index
      %c0_53 = arith.constant 0 : index
      %144 = vector.load %arg8[%c0_52, %c0_53] : memref<1x128xf32, #tpu.memory_space<vmem>>, vector<1x128xf32>
      %145 = vector.broadcast %144 : vector<1x128xf32> to vector<4x128xf32>
      %146 = arith.addf %143, %145 : vector<4x128xf32>
      %c0_54 = arith.constant 0 : index
      %c0_55 = arith.constant 0 : index
      %c0_56 = arith.constant 0 : index
      %147 = vector.load %arg9[%c0_54, %c0_55, %c0_56] : memref<1x4x128xf32, #tpu.memory_space<vmem>>, vector<1x4x128xf32>
      %148 = vector.shape_cast %147 : vector<1x4x128xf32> to vector<4x128xf32>
      %149 = vector.shape_cast %146 : vector<4x128xf32> to vector<1x4x128xf32>
      tpu.vector_store %arg9[%c0_54, %c0_55, %c0_56], %149 {strides = array<i32>} : memref<1x4x128xf32, #tpu.memory_space<vmem>>, vector<1x4x128xf32>,
    } else {
    }
    return
  }
  func.func @transform_0(%arg0: i32, %arg1: i32) -> (i32, i32, i32) {
    %c0_i32 = arith.constant 0 : i32
    %c0_i32_0 = arith.constant 0 : i32
    return %arg0, %arg1, %c0_i32 : i32, i32, i32
  }
  func.func @transform_1(%arg0: i32, %arg1: i32) -> (i32, i32) {
    %c0_i32 = arith.constant 0 : i32
    %c0_i32_0 = arith.constant 0 : i32
    %c0_i32_1 = arith.constant 0 : i32
    return %c0_i32, %c0_i32_0 : i32, i32
  }
  func.func @transform_2(%arg0: i32, %arg1: i32) -> (i32, i32) {
    %c0_i32 = arith.constant 0 : i32
    %c0_i32_0 = arith.constant 0 : i32
    %c0_i32_1 = arith.constant 0 : i32
    return %c0_i32, %c0_i32_0 : i32, i32
  }
  func.func @transform_3(%arg0: i32, %arg1: i32) -> (i32, i32) {
    %c0_i32 = arith.constant 0 : i32
    %c0_i32_0 = arith.constant 0 : i32
    %c0_i32_1 = arith.constant 0 : i32
    return %c0_i32, %c0_i32_0 : i32, i32
  }
  func.func @transform_4(%arg0: i32, %arg1: i32) -> (i32, i32) {
    %c0_i32 = arith.constant 0 : i32
    %c0_i32_0 = arith.constant 0 : i32
    %c0_i32_1 = arith.constant 0 : i32
    return %c0_i32, %c0_i32_0 : i32, i32
  }
  func.func @transform_5(%arg0: i32, %arg1: i32) -> (i32, i32) {
    %c0_i32 = arith.constant 0 : i32
    %c0_i32_0 = arith.constant 0 : i32
    %c0_i32_1 = arith.constant 0 : i32
    return %c0_i32, %c0_i32_0 : i32, i32
  }
  func.func @transform_6(%arg0: i32, %arg1: i32) -> (i32, i32) {
    %c0_i32 = arith.constant 0 : i32
    %c0_i32_0 = arith.constant 0 : i32
    %c0_i32_1 = arith.constant 0 : i32
    return %c0_i32, %c0_i32_0 : i32, i32
  }
  func.func @transform_7(%arg0: i32, %arg1: i32) -> (i32, i32, i32) {
    %c0_i32 = arith.constant 0 : i32
    %c0_i32_0 = arith.constant 0 : i32
    %c0_i32_1 = arith.constant 0 : i32
    return %arg0, %c0_i32, %c0_i32_0 : i32, i32, i32
  }
}

</mosaic_0001>

<bundles_post_ra>
// kernel: tpu_custom_call.1
= control target key start
LH: loop header
LB: loop body
LE: loop exit
PB: predicated region body
PF: predicated region fallthrough
CT: control target
= control target key end

     0   :  { %s2674_s0 = inlined_call_operand.hbm [shape: f32[8,16,48], index: 0, kind: input, shape index: {}]   ;;  %s2675_s1 = inlined_call_operand.hbm [shape: bf16[48,144], index: 1, kind: input, shape index: {}]   ;;  %s2676_s2 = inlined_call_operand.vmem [shape: f32[1,16], index: 2, kind: input, shape index: {}]   ;;  %s2677_s3 = inlined_call_operand.vmem [shape: f32[1,16], index: 3, kind: input, shape index: {}]   ;;  %s2678_s4 = inlined_call_operand.vmem [shape: f32[1,16], index: 4, kind: input, shape index: {}]   ;;  %s2679_s5 = inlined_call_operand.hbm [shape: bf16[48,128], index: 5, kind: input, shape index: {}]   ;;  %s2680_s6 = inlined_call_operand.vmem [shape: f32[1,128], index: 6, kind: input, shape index: {}]   ;;  %s2681_s7 = inlined_call_operand.hbm [shape: f32[2,4,128], index: 7, kind: output, shape index: {}]  }
   0x1   :  { %2695 = sst [smem:[#allocation21_spill]] %s2675_s1 }
   0x2   :  { %2696 = sst [smem:[#allocation22_spill]] %s2679_s5 }
   0x3   :  { %2697 = sst [smem:[#allocation23_spill]] %s2680_s6 }
   0x4   :  { %2698 = sst [smem:[#allocation24_spill]] %s2681_s7 }
   0x5   :  { %12 = vsyncpa [#allocation7], 0 }
   0x6   :  { %14 = vsyncpa [#allocation7 + $0x1], 0 }
   0x7   :  { %15 = vsyncpa [#allocation10], 0 }
   0x8   :  { %16 = vsyncpa [#allocation8], 0 }
   0x9   :  { %18 = vsyncpa [#allocation8 + $0x1], 0  ;;  %s1961_s24 = smov 0   ;;  %s1963_s25 = smov 0  }
   0xa   :  { %s1965_s26 = smov 0   ;;  %s1967_s27 = smov 0  }
   0xb   :  { %s1969_s28 = smov 0   ;;  %s1971_s29 = smov 0  }
   0xc   :  { %s1973_s30 = smov 0   ;;  %s1975_s8 = smov 0  }
   0xd   :  { %s1977_s9 = smov 0   ;;  %s1979_s10 = smov 0  }
   0xe   :  { %s1981_s11 = smov 0  }
   0xf LB: > { %2699 = sst [smem:[#allocation16_spill]] %s1859_s24  ;;  %s1430_s12 = sadd.s32 4294967295, %s1899_s11   ;;  %s1899_s11 = sphi %s1981_s11, %s24_s11   ;;  %s1895_s10 = sphi %s1979_s10, %s2740_s10   ;;  %s1891_s9 = sphi %s1977_s9, %s2739_s9   ;;  %s1887_s8 = sphi %s1975_s8, %s2738_s8   ;;  %s1883_s30 = sphi %s1973_s30, %s2737_s30   ;;  %s1879_s29 = sphi %s1971_s29, %s2736_s29   ;;  %s1875_s28 = sphi %s1969_s28, %s2735_s28   ;;  %s1871_s27 = sphi %s1967_s27, %s2734_s27   ;;  %s1867_s26 = sphi %s1965_s26, %s2733_s26   ;;  %s1863_s25 = sphi %s1963_s25, %s2732_s25   ;;  %s1859_s24 = sphi %s1961_s24, %s2731_s24  }
  0x10   : > { %2700 = sst [smem:[#allocation17_spill]] %s1887_s8  ;;  %s1431_s13 = sadd.s32 4294967294, %s1899_s11  }
  0x11   : > { %2701 = sst [smem:[#allocation18_spill]] %s1899_s11  ;;  %p52_p0 = scmp.ne.s32.totalorder %s1879_s29, %s1875_s28 }
  0x12   : > { %p53_p1 = scmp.eq.s32.totalorder %s1899_s11, 0  ;;  %p58_p2 = scmp.ne.s32.totalorder %s1875_s28, %s1871_s27 }
  0x13   : > { %p2021_p3 = scmp.eq.s32.totalorder %s1430_s12, 0  ;;  %p207_p5 = scmp.ne.s32.totalorder %s1867_s26, %s1863_s25 }
  0x14   : > { %p2026_p4 = por %p53_p1, %p52_p0  ;;  %p208_p7 = scmp.eq.s32.totalorder %s1430_s12, 3 }
  0x15   : > { %s2702_s15 = scalar_select %p2021_p3, 1, 0 }
  0x16   : > { %p2034_p6 = por %p2021_p3, %p58_p2  ;;  %p213_p8 = scmp.ne.s32.totalorder %s1863_s25, %s1859_s24 }
  0x17   : > { %p214_p9 = scmp.eq.s32.totalorder %s1431_s13, 3  ;;  %p2040_p10 = por %p208_p7, %p207_p5 }
  0x18   : > { %s2704_s18 = scalar_select %p2034_p6, 1, 0 }
  0x19   : > { %s2705_s19 = scalar_select %p2040_p10, 1, 0 }
  0x1a   : > { %p1432_p11 = scmp.ge.s32.totalorder %s1899_s11, 1  ;;  %p2045_p12 = por %p214_p9, %p213_p8 }
  0x1b   : > { %2706 = sst [smem:[#allocation19_spill]] %s2705_s19  ;;  %p221_p13 = scmp.lt.s32.totalorder %s1899_s11, 5 }
  0x1c   : > { %s2707_s20 = scalar_select %p2045_p12, 1, 0 }
  0x1d   : > { %p2050_p0 = pnand %p1432_p11, %p221_p13  ;;  %s1901_s22 = smov [#allocation9]  }
  0x1e   : > { %2708 = sst [smem:[#allocation20_spill]] %s2707_s20  ;;  %s233_s23 = sshll.u32 %s1901_s22, 4  ;;  %s2054_s23 = int_to_ptr.vmem [resolvable:$true] %s233_s23 }
  0x1f   : > { %p1548_p1 = pneg %p2050_p0  ;;  %p1565_p2 = scmp.lt.s32.totalorder %s1899_s11, 4 }
  0x20   : > { %s1902_s13 = smov [#allocation11]   ;;  %s2712_s1 = sld [smem:[#allocation21_spill]] }
  0x21   : > { %p2061_p5 = pnand %p1548_p1, %p2021_p3  ;;  %p2067_p7 = pnand %p1565_p2, %p2026_p4 }
  0x22   : > { %s255_s14 = sshll.u32 %s1902_s13, 4  ;;  %s2071_s14 = int_to_ptr.vmem [resolvable:$true] %s255_s14 }
  0x23   : > { %p1689_p9 = pneg %p2061_p5 }
  0x26   : > { %s1687_s20 = scalar_lea.hbm %s2712_s1, 768 }
  0x27   : > { %p1688_p8 = scmp.ne.s32.totalorder %s2712_s1, %s1687_s20  ;;  %p1694_p13 = scmp.lt.u32.totalorder %s1687_s20, %s2712_s1 }
  0x29   : > { %p1690_p4 = pnand %p1689_p9, %p1688_p8 }
  0x2b   : > { %p1691_p11 = pneg %p1690_p4 }
  0x2d   : > { %p1696_p1 = pnand %p1694_p13, %p1691_p11 }
  0x2f   : > { %1699 = shalt.err (!%p1696_p1)
}
  0x30   : > { %s1700_s16 = scalar_lea.vmem %s2054_s23, 768  ;;  %p1708_p3 = scmp.lt.s32.totalorder %s2054_s23, %s2054_s23 }
  0x31   : > { %p1701_p2 = scmp.ne.s32.totalorder %s2054_s23, %s1700_s16  ;;  %p1709_p8 = scmp.lt.s32.totalorder %s1700_s16, %s1700_s16 }
  0x33   : > { %p1703_p12 = pnand %p1701_p2, %p1689_p9  ;;  %p1710_p4 = por %p1709_p8, %p1708_p3 }
  0x35   : > { %p1704_p10 = pneg %p1703_p12 }
  0x37   : > { %p1711_p6 = pnand %p1710_p4, %p1704_p10 }
  0x39   : > { %1714 = shalt.err (!%p1711_p6)
}
  0x3a   : > { %s2693_s7 = smov 128   ;;  %s2694_s24 = smov 8  }
  0x3b   : > { %1551 = dma.hbm_to_vmem [thread:$0]  (!%p2061_p5), %s2712_s1, 768, %s2054_s23, [#allocation10], %s2693_s7, %s2693_s7, %s2694_s24  }
  0x3c   : > { %s2713_s5 = sld [smem:[#allocation22_spill]] }
  0x42   : > { %s1715_s17 = scalar_lea.hbm %s2713_s5, 384 }
  0x43   : > { %p1716_p3 = scmp.ne.s32.totalorder %s2713_s5, %s1715_s17  ;;  %p1722_p12 = scmp.lt.u32.totalorder %s1715_s17, %s2713_s5 }
  0x45   : > { %p1718_p6 = pnand %p1716_p3, %p1689_p9 }
  0x47   : > { %p1719_p10 = pneg %p1718_p6 }
  0x49   : > { %p1724_p11 = pnand %p1722_p12, %p1719_p10 }
  0x4b   : > { %1727 = shalt.err (!%p1724_p11)
}
  0x4c   : > { %s1728_s23 = scalar_lea.vmem %s2071_s14, 384  ;;  %p1736_p8 = scmp.lt.s32.totalorder %s2071_s14, %s2071_s14 }
  0x4d   : > { %p1729_p13 = scmp.ne.s32.totalorder %s2071_s14, %s1728_s23  ;;  %p1737_p4 = scmp.lt.s32.totalorder %s1728_s23, %s1728_s23 }
  0x4f   : > { %p1731_p1 = pnand %p1729_p13, %p1689_p9  ;;  %p1738_p3 = por %p1737_p4, %p1736_p8 }
  0x51   : > { %p1732_p2 = pneg %p1731_p1 }
  0x53   : > { %p1739_p6 = pnand %p1738_p3, %p1732_p2 }
  0x55   : > { %1742 = shalt.err (!%p1739_p6)
}
  0x56   : > { %s1905_s6 = smov 64   ;;  %s1906_s8 = smov 4  }
  0x57   : > { %1554 = dma.hbm_to_vmem [thread:$0]  (!%p2061_p5), %s2713_s5, 384, %s2071_s14, [#allocation10], %s1905_s6, %s1905_s6, %s1906_s8  }
  0x58   : > { %s33_s20 = sadd.s32 1, %s1891_s9  ;;  %s36_s13 = sadd.s32 1, %s1895_s10 }
  0x59   : > { %p34_p9 = scmp.ge.s32.totalorder %s33_s20, 2  ;;  %s272_s22 = sand.u32 1, %s1879_s29  }
  0x5a   : > { %s1505_s17 = sshll.u32 %s1895_s10, 3  ;;  %s1436_s27 = sshll.u32 %s272_s22, 5 }
  0x5b   : > { %s2742_s20 = smov (%p34_p9, %s33_s20), 0  ;;  %s2744_s13 = smov (!%p34_p9, %s36_s13), %s1895_s10 }
  0x5c   : > { %s41_s16 = ssub.s32 %s1891_s9, %s2742_s20  ;;  %p38_p10 = scmp.ge.s32.totalorder %s2744_s13, 2 }
  0x5d   : > { %s282_s23 = sadd.s32 %s1891_s9, %s1505_s17  ;;  %s276_s6 = scalar_lea.vmem [#allocation6], %s1436_s27 }
  0x5e   : > { %s2746_s13 = smov (%p38_p10, %s2744_s13), 0  ;;  %s1439_s14 = sshll.u32 %s282_s23, 7 }
  0x5f   : > { %s285_s8 = sshll.u32 %s276_s6, 4  ;;  %s40_s19 = ssub.s32 %s1895_s10, %s2746_s13  ;;  %s2147_s8 = int_to_ptr.vmem [resolvable:$true] %s285_s8 }
  0x60   : > { %s2145_s24 = scalar_lea.hbm %s2674_s0, %s1439_s14  ;;  %s42_s1 = sor.u32 %s41_s16, %s40_s19 }
  0x61   : > { %p195_p5 = scmp.eq.s32.totalorder %s40_s19, 0  ;;  %p43_p12 = scmp.eq.s32.totalorder %s42_s1, 0 }
  0x62   : > { %s2714_s17 = sadd.s32 1, %s1867_s26  ;;  %s2715_s27 = sadd.s32 1, %s1879_s29 }
  0x63   : > { %s2152_s5 = scalar_select %p195_p5, %s1867_s26, %s2714_s17  }
  0x64   : > { %s2157_s23 = scalar_select %p43_p12, %s1879_s29, %s2715_s27  }
  0x65   : > { %s2159_s6 = scalar_lea.sflag [#allocation7], %s272_s22  ;;  %s1743_s7 = scalar_lea.hbm %s2145_s24, 512 }
  0x66   : > { %p1744_p11 = scmp.ne.s32.totalorder %s2145_s24, %s1743_s7  ;;  %p1745_p13 = pneg %p2067_p7 }
  0x67   : > { %s1748_s14 = scalar_lea.hbm %s2674_s0, 2048  ;;  %p1749_p8 = scmp.lt.u32.totalorder %s2145_s24, %s2674_s0 }
  0x68   : > { %p1746_p1 = pnand %p1745_p13, %p1744_p11  ;;  %p1750_p4 = scmp.lt.u32.totalorder %s1748_s14, %s1743_s7 }
  0x69   : > { %p1752_p6 = scmp.lt.u32.totalorder %s1743_s7, %s2145_s24 }
  0x6a   : > { %p1747_p2 = pneg %p1746_p1  ;;  %p1751_p3 = por %p1750_p4, %p1749_p8 }
  0x6c   : > { %p1753_p9 = por %p1752_p6, %p1751_p3 }
  0x6e   : > { %p1754_p10 = pnand %p1753_p9, %p1747_p2 }
  0x70   : > { %1757 = shalt.err (!%p1754_p10)
}
  0x71   : > { %s1758_s22 = scalar_lea.vmem %s2147_s8, 512  ;;  %s1907_s17 = smov [#allocation6]  }
  0x72   : > { %p1759_p5 = scmp.ne.s32.totalorder %s2147_s8, %s1758_s22  ;;  %s1763_s27 = sshll.u32 %s1907_s17, 4  ;;  %s1764_s27 = int_to_ptr.vmem [resolvable:$false] %s1763_s27 }
  0x73   : > { %s1765_s16 = scalar_lea.vmem %s1764_s27, 1024  ;;  %p1766_p1 = scmp.lt.s32.totalorder %s2147_s8, %s1764_s27 }
  0x74   : > { %p1761_p12 = pnand %p1759_p5, %p1745_p13  ;;  %p1767_p8 = scmp.lt.s32.totalorder %s1765_s16, %s1758_s22 }
  0x76   : > { %p1762_p11 = pneg %p1761_p12  ;;  %p1768_p4 = por %p1767_p8, %p1766_p1 }
  0x78   : > { %p1769_p3 = pnand %p1768_p4, %p1762_p11 }
  0x7a   : > { %1772 = shalt.err (!%p1769_p3)
}
  0x7b   : > { %s1908_s7 = smov 256   ;;  %s2716_s1 = smov 8  }
  0x7c   : > { %s2717_s14 = smov 128   ;;  %297 = sbr.rel (%p2050_p0) target bundleno = 1057 (0x421), region = 48 }
  0x7d   : > { %1558 = dma.hbm_to_vmem [thread:$0]  (!%p2067_p7), %s2145_s24, 512, %s2147_s8, %s2159_s6, %s1908_s7, %s2717_s14, %s2716_s1  }
  0x7e   : > { %s299_s19 = sand.u32 (!%p2050_p0), 1, %s1875_s28   ;;  %p2718_p13 = scmp.ne.s32.totalorder (!%p2050_p0), %s2704_s18, 0 }
  0x7f   : > { %s1441_s11 = sshll.u32 (!%p2050_p0), %s299_s19, 5  ;;  %s300_s22 = scalar_lea.sflag (!%p2050_p0), [#allocation7], %s299_s19 }
  0x80   : > { %s2192_s17 = scalar_lea.vmem (!%p2050_p0), [#allocation6], %s1441_s11 }
  0x83   : > { %1846 = dma.done.wait (%p2718_p13), %s300_s22, 512  }
  0x84   : > { %1848 = vsyncadd (%p2718_p13), %s300_s22, 4294966784  ;;  %p2719_p2 = scmp.ne.s32.totalorder %s2702_s15, 0 }
  0x86   : > { %1850 = dma.done.wait (%p2719_p2), [#allocation10], 1152  }
  0x87   : > { %1852 = vsyncadd (%p2719_p2), [#allocation10], 4294966144  ;;  %s339_s21 = sand.u32 1, %s1863_s25   ;;  %p1445_p0 = scmp.ne.s32.totalorder %s1883_s30, 0 }
  0x88   : > { %s2205_s12 = sshll.u32 %s339_s21, 2  ;;  %vm348_vm0 = vcmask (!%p1445_p0), 1042432   ;;  %vm349_vm1 = vcmask (!%p1445_p0), 129028   ;;  %vm355_vm2 = vcmask (!%p1445_p0), 125952   ;;  %v1909_v0 = vmov (!%p1445_p0), -1e+30  }
  0x89   : > { %s341_s24 = scalar_lea.vmem [#allocation12], %s2205_s12  ;;  %347 = sbr.rel (%p1445_p0) target bundleno = 144 (0x90), region = 64  ;;  %vm350_vm3 = vmor (!%p1445_p0), %vm349_vm1, %vm348_vm0  ;;  %356 = vst.msk [vmem:[#allocation3] sm:$0xf] (!%p1445_p0), %vm355_vm2, %v1909_v0 }
  0x8a   : > { %357 = vst.msk [vmem:[#allocation4] sm:$0xf] (!%p1445_p0), %vm355_vm2, %v1909_v0  ;;  %358 = vst.msk [vmem:[#allocation5] sm:$0xf] (!%p1445_p0), %vm355_vm2, %v1909_v0 }
  0x8b   : > { %351 = vst.msk [vmem:[#allocation2] sm:$0x77] (!%p1445_p0), %vm350_vm3, %v1909_v0  ;;  %352 = vst.msk [vmem:[#allocation2 + $0x8] sm:$0x77] (!%p1445_p0), %vm350_vm3, %v1909_v0 }
  0x8c   : > { %353 = vst.msk [vmem:[#allocation2 + $0x10] sm:$0x77] (!%p1445_p0), %vm350_vm3, %v1909_v0  ;;  %354 = vst.msk [vmem:[#allocation2 + $0x18] sm:$0x77] (!%p1445_p0), %vm350_vm3, %v1909_v0 }
  0x90 PF: > { %v1675_v1 = vld [vmem:[#allocation9 + $0x4] ss:$8 sps:$4 sm:$0xff]   ;;  %v1677_v2 = vld [vmem:[#allocation9] ss:$8 sps:$4 sm:$0xff]   ;;  %v1910_v3 = vmov 0   ;;  %v361_v16 = vld [vmem:[%s2192_s17 + $0x10] sm:$0xff]  ;;  %v496_v22 = vlaneseq }
  0x91   : > { %440 = vmatprep.mubr.bf16.mxu0 %v1910_v3  ;;  %450 = vmatprep.mubr.bf16.mxu1 %v1910_v3  ;;  %v1678_v4 = vld [vmem:[#allocation9 + $0x14] ss:$8 sps:$4 sm:$0xff]   ;;  %v1680_v5 = vld [vmem:[#allocation9 + $0x10] ss:$8 sps:$4 sm:$0xff]   ;;  %v1681_v6 = vld [vmem:[#allocation9 + $0x24] ss:$8 sps:$4 sm:$0xff]  }
  0x92   : > { %408 = vmatprep.subr.bf16.mxu0 %v1675_v1  ;;  %1530 = vmatprep.subr.bf16.mxu1 %v1675_v1  ;;  %v1683_v7 = vld [vmem:[#allocation9 + $0x20] ss:$8 sps:$4 sm:$0xff]   ;;  %v2218_v14 = vld [vmem:[#allocation2] sm:$0x77]  ;;  %s1911_s15 = smov 112   ;;  %vm401_vm4 = vcmask 392192  }
  0x93   : > { %409 = vmatpush1.bf16.msra.mxu0 %v1677_v2  ;;  %1533 = vmatpush1.bf16.msra.mxu1 %v1677_v2  ;;  %v359_v8 = vld [vmem:[%s2192_s17] sm:$0xff]  ;;  %v2216_v13 = vld [vmem:[#allocation2 + $0x18] sm:$0x77]  ;;  %v362_v17 = vld [vmem:[%s2192_s17 + $0x18] sm:$0xff]  ;;  %v1458_v19 = vrot.slane %v2218_v14, 9  ;;  %v2229_v23 = vshrl.u32 %v496_v22, 7 }
  0x94   : > { %410 = vmatprep.subr.bf16.mxu0 %v1678_v4  ;;  %1531 = vmatprep.subr.bf16.mxu1 %v1678_v4  ;;  %v2210_v9 = vld [vmem:[#allocation2 + $0x10] sm:$0x77]  ;;  %v2212_v10 = vld [vmem:[#allocation2 + $0x8] sm:$0x77]  ;;  %v1461_v18 = vrot.slane %v2216_v13, 9  ;;  %v364_v21 = vpack.c.bf16 %v362_v17, %v361_v16  ;;  %vm489_vm5 = vcmask 1042432  }
  0x95   : > { %v1460_v11 = vrot.slane %v2210_v9, 9  ;;  %v1459_v12 = vrot.slane %v2212_v10, 9  ;;  %v360_v15 = vld [vmem:[%s2192_s17 + $0x8] sm:$0xff]  ;;  %vm490_vm6 = vcmask 129028   ;;  %s1912_s18 = smov 32   ;;  %vm974_vm8 = vcmp.lt.s32.totalorder %v2229_v23, 5 }
  0x96   : > { %v363_v20 = vpack.c.bf16 %v360_v15, %v359_v8  ;;  %vm2248_vm7 = vmor %vm490_vm6, %vm489_vm5  ;;  %s1913_s8 = smov 80   ;;  %s1914_s6 = smov 16   ;;  %v1471_v49 = vrot.slane %v2212_v10, 10  ;;  %v1472_v50 = vrot.slane %v2210_v9, 10  ;;  %vm514_vm9 = vcmp.lt.s32.totalorder %v2229_v23, 7 }
  0x97   : > { %411 = vmatpush1.bf16.msra.mxu0 %v1680_v5  ;;  %1534 = vmatpush1.bf16.msra.mxu1 %v1680_v5  ;;  %s1915_s27 = smov 64   ;;  %s1916_s16 = smov 96   ;;  %vm723_vm10 = vcmp.lt.s32.totalorder %v2229_v23, 6  ;;  %vm999_vm11 = vcmp.le.s32.totalorder %v2229_v23, 4  ;;  %vm1004_vm12 = vcmask 786048   ;;  %vm748_vm13 = vcmp.le.s32.totalorder %v2229_v23, 5 }
  0x98   : > { %412 = vmatprep.subr.bf16.mxu0 %v1681_v6  ;;  %1532 = vmatprep.subr.bf16.mxu1 %v1681_v6  ;;  %vm753_vm14 = vcmask 392448   ;;  %vm523_vm15 = vcmp.le.s32.totalorder %v2229_v23, 6  ;;  %vm528_vm0 = vcmask 130048   ;;  %vm655_vm1 = vcmask 1041409   ;;  %s1917_s7 = smov 48   ;;  %p1490_p7 = scmp.ne.s32.totalorder %s1883_s30, 1 }
  0x99   : > { %573 = vrot.lane.b32.xlu1 %v1460_v11, %s1911_s15  ;;  %571 = vrot.lane.b32.xlu0 %v1459_v12, %s1911_s15  ;;  %vm658_vm2 = vcmask 1042434   ;;  %vm661_vm3 = vcmask 1043459   ;;  %vm1919_vm5 = vmmov (!%p1490_p7), 0  }
  0x9b   : > { %413 = vmatpush1.bf16.msra.mxu0 %v1683_v7  ;;  %1535 = vmatpush1.bf16.msra.mxu1 %v1683_v7 }
  0x9d   : > { %575 = vrot.lane.b32.xlu1 %v1461_v18, %s1911_s15  ;;  %569 = vrot.lane.b32.xlu0 %v1458_v19, %s1911_s15 }
  0x9e   : > { %1452 = vmatmul.mubr.msk.bf16.vlgmr.msra.gmra.mrb[0].mxu0 %vm401_vm4, %v363_v20  ;;  %1453 = vmatmul.mubr.msk.bf16.vlgmr.msra.gmra.mrb[0].mxu1 %vm401_vm4, %v364_v21  ;;  %vm665_vm4 = vcmask 125952  }
 0x10b   : > { %v574_v59 = vpop.permute.xlu1 %573  ;;  %v572_v60 = vpop.permute.xlu0 %571 }
 0x10f   : > { %v2322_v61 = vpop.permute.xlu1 %575  ;;  %v2324_v62 = vpop.permute.xlu0 %569 }
 0x171   : > { %v2231_v24 = vpop.f32.mrb[0].mxu0  ;;  %v2233_v25 = vpop.f32.mrb[0].mxu1 }
 0x172   : > { %894 = vrot.lane.b32.xlu0 %v2233_v25, %s1912_s18  ;;  %v454_v26 = vpop.f32.mrb[1].mxu1  ;;  %890 = vrot.lane.b32.xlu1 %v2231_v24, %s1912_s18  ;;  %v2239_v27 = vpop.f32.mrb[1].mxu0  ;;  %v808_v51 = vrot.slane %v2233_v25, 7  ;;  %v806_v52 = vrot.slane %v2231_v24, 7  ;;  %v607_v53 = vrot.slane %v2233_v25, 6  ;;  %v605_v54 = vrot.slane %v2231_v24, 6 }
 0x173   : > { %v475_v28 = vcombine.high %v2233_v25, %v454_v26  ;;  %v473_v29 = vcombine.high %v2231_v24, %v2239_v27  ;;  %v2244_v30 = vpop.f32.mrb[2].mxu0  ;;  %v2246_v31 = vpop.f32.mrb[2].mxu1  ;;  %v972_v33 = vrot.slane %v454_v26, 3  ;;  %v970_v34 = vrot.slane %v2239_v27, 3 }
 0x174   : > { %v448_v35 = vpop.f32.mrb[3].mxu0  ;;  %v2253_v36 = vpop.f32.mrb[3].mxu1  ;;  %v606_v55 = vrot.slane %v2244_v30, 6  ;;  %v807_v56 = vrot.slane %v2244_v30, 7  ;;  %v809_v57 = vrot.slane %v2246_v31, 7  ;;  %v608_v58 = vrot.slane %v2246_v31, 6 }
 0x175   : > { %v1456_v37 = vrot.slane %v475_v28, 9  ;;  %v1454_v38 = vrot.slane %v473_v29, 9  ;;  %v474_v39 = vcombine.high %v2244_v30, %v448_v35  ;;  %v971_v40 = vrot.slane %v448_v35, 3 }
 0x176   : > { %v476_v41 = vcombine.high %v2246_v31, %v2253_v36  ;;  %v973_v42 = vrot.slane %v2253_v36, 3  ;;  %671 = vrot.lane.b32.xlu0 %v2233_v25, %s1913_s8  ;;  %934 = vrot.lane.b32.xlu1 %v2233_v25, %s1914_s6 }
 0x177   : > { %494 = vst.msk [vmem:[#allocation2 + $0x10] sm:$0x77] %vm2248_vm7, %v1456_v37  ;;  %492 = vst.msk [vmem:[#allocation2] sm:$0x77] %vm2248_vm7, %v1454_v38  ;;  %v1455_v43 = vrot.slane %v474_v39, 9  ;;  %v977_v44 = vsel %vm974_vm8, %v970_v34, %v971_v40  ;;  %v976_v45 = vsel %vm974_vm8, %v971_v40, %v972_v33 }
 0x178   : > { %v1457_v46 = vrot.slane %v476_v41, 9  ;;  %v975_v47 = vsel %vm974_vm8, %v972_v33, %v973_v42  ;;  %v978_v48 = vsel %vm974_vm8, %v973_v42, %v970_v34  ;;  %v2353_v42 = vadd.f32 %v572_v60, %v2212_v10 }
 0x179   : > { %493 = vst.msk [vmem:[#allocation2 + $0x8] sm:$0x77] %vm2248_vm7, %v1455_v43 }
 0x17a   : > { %495 = vst.msk [vmem:[#allocation2 + $0x18] sm:$0x77] %vm2248_vm7, %v1457_v46  ;;  %667 = vrot.lane.b32.xlu0 %v2231_v24, %s1913_s8  ;;  %930 = vrot.lane.b32.xlu1 %v2231_v24, %s1914_s6 }
 0x17e   : > { %711 = vrot.lane.b32.xlu0 %v2233_v25, %s1915_s27  ;;  %707 = vrot.lane.b32.xlu1 %v2231_v24, %s1915_s27 }
 0x182   : > { %896 = vrot.lane.b32.xlu1 %v2246_v31, %s1912_s18  ;;  %892 = vrot.lane.b32.xlu0 %v2244_v30, %s1912_s18 }
 0x186   : > { %669 = vrot.lane.b32.xlu1 %v2244_v30, %s1913_s8  ;;  %932 = vrot.lane.b32.xlu0 %v2244_v30, %s1914_s6 }
 0x18a   : > { %936 = vrot.lane.b32.xlu1 %v2246_v31, %s1914_s6  ;;  %673 = vrot.lane.b32.xlu0 %v2246_v31, %s1913_s8 }
 0x18e   : > { %709 = vrot.lane.b32.xlu1 %v2244_v30, %s1915_s27  ;;  %713 = vrot.lane.b32.xlu0 %v2246_v31, %s1915_s27 }
 0x192   : > { %1037 = vrot.lane.b32.xlu1 %v454_v26, %s1913_s8  ;;  %792 = vrot.lane.b32.xlu0 %v1471_v49, %s1916_s16  ;;  %v2363_v49 = vadd.f32 %v574_v59, %v2210_v9 }
 0x196   : > { %814 = vrot.lane.b32.xlu1 %v808_v51, %s1916_s16  ;;  %794 = vrot.lane.b32.xlu0 %v1472_v50, %s1916_s16 }
 0x19a   : > { %810 = vrot.lane.b32.xlu1 %v806_v52, %s1916_s16  ;;  %613 = vrot.lane.b32.xlu0 %v607_v53, %s1911_s15 }
 0x19e   : > { %609 = vrot.lane.b32.xlu0 %v605_v54, %s1911_s15  ;;  %1035 = vrot.lane.b32.xlu1 %v448_v35, %s1913_s8 }
 0x1a2   : > { %611 = vrot.lane.b32.xlu0 %v606_v55, %s1911_s15  ;;  %812 = vrot.lane.b32.xlu1 %v807_v56, %s1916_s16 }
 0x1a6   : > { %816 = vrot.lane.b32.xlu0 %v809_v57, %s1916_s16  ;;  %615 = vrot.lane.b32.xlu1 %v608_v58, %s1911_s15 }
 0x1aa   : > { %983 = vrot.lane.b32.xlu0 %v977_v44, %s1913_s8  ;;  %985 = vrot.lane.b32.xlu1 %v976_v45, %s1913_s8 }
 0x1ae   : > { %987 = vrot.lane.b32.xlu1 %v975_v47, %s1913_s8 }
 0x1b2   : > { %989 = vrot.lane.b32.xlu1 %v978_v48, %s1913_s8 }
 0x1e4   : > { %v895_v63 = vpop.permute.xlu0 %894  ;;  %v891_v0 = vpop.permute.xlu1 %890 }
 0x1e5   : > { %v904_v11 = vrot.slane %v895_v63, 1  ;;  %v902_v20 = vrot.slane %v891_v0, 1 }
 0x1e8   : > { %v672_v1 = vpop.permute.xlu0 %671  ;;  %v935_v2 = vpop.permute.xlu1 %934 }
 0x1e9   : > { %v681_v21 = vrot.slane %v672_v1, 1  ;;  %v944_v34 = vrot.slane %v935_v2, 2 }
 0x1ec   : > { %v668_v3 = vpop.permute.xlu0 %667  ;;  %v2326_v4 = vpop.permute.xlu1 %930 }
 0x1ed   : > { %v679_v47 = vrot.slane %v668_v3, 1  ;;  %v942_v53 = vrot.slane %v2326_v4, 2 }
 0x1f0   : > { %v2328_v5 = vpop.permute.xlu0 %711  ;;  %v2330_v6 = vpop.permute.xlu1 %707 }
 0x1f1   : > { %v721_v56 = vrot.slane %v2328_v5, 2  ;;  %v719_v5 = vrot.slane %v2330_v6, 2  ;;  %v1473_v6 = vrot.slane %v2216_v13, 10 }
 0x1f4   : > { %v897_v7 = vpop.permute.xlu1 %896  ;;  %v893_v8 = vpop.permute.xlu0 %892 }
 0x1f5   : > { %v905_v12 = vrot.slane %v897_v7, 1  ;;  %v903_v15 = vrot.slane %v893_v8, 1 }
 0x1f7   : > { %v907_v16 = vsel %vm514_vm9, %v903_v15, %v904_v11  ;;  %v906_v17 = vsel %vm514_vm9, %v904_v11, %v905_v12  ;;  %v908_v29 = vsel %vm514_vm9, %v902_v20, %v903_v15  ;;  %v909_v38 = vsel %vm514_vm9, %v905_v12, %v902_v20 }
 0x1f8   : > { %v670_v18 = vpop.permute.xlu1 %669  ;;  %v933_v19 = vpop.permute.xlu0 %932  ;;  %916 = vrot.lane.b32.xlu0 %v907_v16, %s1913_s8  ;;  %918 = vrot.lane.b32.xlu1 %v906_v17, %s1913_s8 }
 0x1f9   : > { %v680_v22 = vrot.slane %v670_v18, 1  ;;  %v943_v26 = vrot.slane %v933_v19, 2 }
 0x1fb   : > { %v684_v28 = vsel %vm514_vm9, %v680_v22, %v681_v21  ;;  %v947_v39 = vsel %vm723_vm10, %v943_v26, %v944_v34  ;;  %v685_v51 = vsel %vm514_vm9, %v679_v47, %v680_v22  ;;  %v948_v60 = vsel %vm723_vm10, %v942_v53, %v943_v26 }
 0x1fc   : > { %v937_v32 = vpop.permute.xlu1 %936  ;;  %v674_v33 = vpop.permute.xlu0 %673  ;;  %693 = vrot.lane.b32.xlu0 %v684_v28, %s1912_s18  ;;  %914 = vrot.lane.b32.xlu1 %v908_v29, %s1913_s8 }
 0x1fd   : > { %v945_v35 = vrot.slane %v937_v32, 2  ;;  %v682_v37 = vrot.slane %v674_v33, 1 }
 0x1ff   : > { %v683_v43 = vsel %vm514_vm9, %v681_v21, %v682_v37  ;;  %v946_v44 = vsel %vm723_vm10, %v944_v34, %v945_v35  ;;  %v686_v52 = vsel %vm514_vm9, %v682_v37, %v679_v47  ;;  %v949_v16 = vsel %vm723_vm10, %v945_v35, %v942_v53 }
 0x200   : > { %v710_v40 = vpop.permute.xlu1 %709  ;;  %v714_v41 = vpop.permute.xlu0 %713  ;;  %920 = vrot.lane.b32.xlu0 %v909_v38, %s1913_s8  ;;  %956 = vrot.lane.b32.xlu1 %v947_v39, %s1913_s8  ;;  %v1470_v35 = vrot.slane %v2218_v14, 10 }
 0x201   : > { %v720_v50 = vrot.slane %v710_v40, 2  ;;  %v722_v59 = vrot.slane %v714_v41, 2 }
 0x203   : > { %v725_v2 = vsel %vm723_vm10, %v720_v50, %v721_v56  ;;  %v727_v17 = vsel %vm723_vm10, %v722_v59, %v719_v5  ;;  %v724_v22 = vsel %vm723_vm10, %v721_v56, %v722_v59  ;;  %v726_v32 = vsel %vm723_vm10, %v719_v5, %v720_v50 }
 0x204   : > { %v1038_v45 = vpop.permute.xlu1 %1037  ;;  %v793_v46 = vpop.permute.xlu0 %792  ;;  %695 = vrot.lane.b32.xlu0 %v683_v43, %s1912_s18  ;;  %958 = vrot.lane.b32.xlu1 %v946_v44, %s1913_s8 }
 0x205   : > { %v803_v48 = vadd.f32 %v793_v46, %v2353_v42 }
 0x208   : > { %v815_v54 = vpop.permute.xlu1 %814  ;;  %v795_v55 = vpop.permute.xlu0 %794  ;;  %691 = vrot.lane.b32.xlu0 %v685_v51, %s1912_s18  ;;  %697 = vrot.lane.b32.xlu1 %v686_v52, %s1912_s18 }
 0x209   : > { %v824_v57 = vadd.f32 %v815_v54, %v2363_v49  ;;  %v804_v58 = vadd.f32 %v795_v55, %v2363_v49 }
 0x20b   : > { %v1476_v63 = vrot.slane %v824_v57, 9  ;;  %v1051_v0 = vadd.f32 %v1038_v45, %v824_v57  ;;  %v1047_v1 = vadd.f32 %v1038_v45, %v804_v58 }
 0x20c   : > { %v2379_v3 = vpop.permute.xlu1 %810  ;;  %v614_v4 = vpop.permute.xlu0 %613  ;;  %734 = vrot.lane.b32.xlu0 %v725_v2, %s1912_s18  ;;  %954 = vrot.lane.b32.xlu1 %v948_v60, %s1913_s8 }
 0x20d   : > { %v1484_v7 = vrot.slane %v1051_v0, 9  ;;  %v844_v8 = vmax.f32 %v804_v58, %v1476_v63  ;;  %v2385_v11 = vadd.f32 %v614_v4, %v2210_v9 }
 0x20f   : > { %v1071_v12 = vmax.f32 %v1047_v1, %v1484_v7  ;;  %v848_v15 = vadd.f32 %v815_v54, %v2385_v11 }
 0x210   : > { %v1036_v18 = vpop.permute.xlu1 %1035  ;;  %960 = vrot.lane.b32.xlu0 %v949_v16, %s1913_s8  ;;  %738 = vrot.lane.b32.xlu1 %v727_v17, %s1912_s18 }
 0x211   : > { %v1480_v19 = vrot.slane %v848_v15, 10  ;;  %v1075_v20 = vadd.f32 %v1038_v45, %v848_v15  ;;  %v1046_v37 = vadd.f32 %v1036_v18, %v803_v48 }
 0x213   : > { %v2395_v9 = vmax.f32 %v844_v8, %v1480_v19  ;;  %v1488_v21 = vrot.slane %v1075_v20, 10  ;;  %v2448_v8 = vadd.f32 %v2324_v62, %v2218_v14  ;;  %v2455_v19 = vadd.f32 %v2322_v61, %v2216_v13 }
 0x214   : > { %v813_v26 = vpop.permute.xlu1 %812  ;;  %736 = vrot.lane.b32.xlu0 %v724_v22, %s1912_s18  ;;  %796 = vrot.lane.b32.xlu1 %v1473_v6, %s1916_s16 }
 0x215   : > { %v2401_v28 = vmax.f32 %v1071_v12, %v1488_v21  ;;  %v823_v29 = vadd.f32 %v813_v26, %v2353_v42  ;;  %v2459_v20 = vadd.f32 %v2379_v3, %v2448_v8 }
 0x217   : > { %v1475_v33 = vrot.slane %v823_v29, 9  ;;  %v1050_v34 = vadd.f32 %v1036_v18, %v823_v29  ;;  %v1463_v29 = vrot.slane %v2353_v42, 9 }
 0x218   : > { %732 = vrot.lane.b32.xlu0 %v726_v32, %s1912_s18  ;;  %1039 = vrot.lane.b32.xlu1 %v2253_v36, %s1913_s8  ;;  %v610_v36 = vpop.permute.xlu0 %609  ;;  %v2425_v41 = vpop.permute.xlu1 %615  ;;  %s2722_s18 = sld [smem:[#allocation23_spill]] (!%p1490_p7) }
 0x219   : > { %v2410_v38 = vmax.f32 %v803_v48, %v1475_v33  ;;  %v1483_v39 = vrot.slane %v1050_v34, 9 }
 0x21b   : > { %v2412_v40 = vmax.f32 %v1046_v37, %v1483_v39  ;;  %v1474_v39 = vrot.slane %v2459_v20, 9 }
 0x21c   : > { %790 = vrot.lane.b32.xlu0 %v1470_v35, %s1916_s16  ;;  %502 = vrot.lane.b32.xlu1 %v2233_v25, %s1911_s15  ;;  %v612_v43 = vpop.permute.xlu0 %611  ;;  %v986_v44 = vpop.permute.xlu1 %985 }
 0x21d   : > { %v2433_v54 = vadd.f32 %v612_v43, %v2212_v10  ;;  %v2443_v10 = vadd.f32 %v610_v36, %v2218_v14 }
 0x21f   : > { %v2438_v60 = vadd.f32 %v813_v26, %v2433_v54  ;;  %v2463_v14 = vadd.f32 %v2379_v3, %v2443_v10 }
 0x220   : > { %1033 = vrot.lane.b32.xlu0 %v2239_v27, %s1913_s8  ;;  %498 = vrot.lane.b32.xlu1 %v2231_v24, %s1911_s15  ;;  %v2427_v45 = vpop.permute.xlu0 %816  ;;  %v988_v46 = vpop.permute.xlu1 %987 }
 0x221   : > { %v1074_v12 = vadd.f32 %v1036_v18, %v2438_v60  ;;  %v1478_v36 = vrot.slane %v2463_v14, 10  ;;  %v1479_v43 = vrot.slane %v2438_v60, 10 }
 0x223   : > { %v1487_v61 = vrot.slane %v1074_v12, 10 }
 0x224   : > { %500 = vrot.lane.b32.xlu0 %v2244_v30, %s1911_s15  ;;  %v984_v47 = vpop.permute.xlu0 %983  ;;  %v2429_v48 = vpop.permute.xlu1 %989 }
 0x228   : > { %504 = vrot.lane.b32.xlu0 %v2246_v31, %s1911_s15 }
 0x26a   : > { %v917_v27 = vpop.permute.xlu0 %916  ;;  %v919_v50 = vpop.permute.xlu1 %918 }
 0x26b   : > { %v927_v53 = vadd.f32 %v917_v27, %v2244_v30  ;;  %v928_v58 = vadd.f32 %v919_v50, %v2233_v25 }
 0x26e   : > { %v694_v51 = vpop.permute.xlu0 %693  ;;  %v915_v52 = vpop.permute.xlu1 %914 }
 0x26f   : > { %v704_v18 = vadd.f32 %v694_v51, %v2244_v30  ;;  %v926_v21 = vadd.f32 %v915_v52, %v2231_v24  ;;  %v2480_v52 = vmax.f32 %v2412_v40, %v1487_v61 }
 0x272   : > { %v921_v55 = vpop.permute.xlu0 %920  ;;  %v957_v56 = vpop.permute.xlu1 %956 }
 0x273   : > { %v967_v57 = vadd.f32 %v957_v56, %v927_v53  ;;  %v929_v53 = vadd.f32 %v921_v55, %v2246_v31 }
 0x275   : > { %v996_v59 = vadd.f32 %v986_v44, %v967_v57  ;;  %v2475_v44 = vadd.f32 %v2427_v45, %v2455_v19 }
 0x276   : > { %v696_v63 = vpop.permute.xlu0 %695  ;;  %v959_v0 = vpop.permute.xlu1 %958 }
 0x277   : > { %v1001_v1 = vsel %vm999_vm11, %v996_v59, -1e+30  ;;  %v968_v2 = vadd.f32 %v959_v0, %v928_v58 }
 0x278   : > { %v1012_v4 = vsel %vm1004_vm12, %v1001_v1, -inf }
 0x279   : > { %v1013_v5 = vrot.slane %v1012_v4, 4  ;;  %v997_v7 = vadd.f32 %v988_v46, %v968_v2 }
 0x27a   : > { %v692_v15 = vpop.permute.xlu0 %691  ;;  %v698_v16 = vpop.permute.xlu1 %697 }
 0x27b   : > { %v1014_v17 = vmax.f32 %v1012_v4, %v1013_v5  ;;  %v1002_v6 = vsel %vm999_vm11, %v997_v7, -1e+30  ;;  %v706_v56 = vadd.f32 %v698_v16, %v2246_v31 }
 0x27c   : > { %v1019_v62 = vsel %vm1004_vm12, %v1002_v6, -inf  ;;  %v703_v6 = vadd.f32 %v692_v15, %v2231_v24 }
 0x27d   : > { %v1015_v22 = vrot.slane %v1014_v17, 2  ;;  %v1020_v26 = vrot.slane %v1019_v62, 4 }
 0x27e   : > { %v735_v32 = vpop.permute.xlu0 %734  ;;  %v955_v33 = vpop.permute.xlu1 %954 }
 0x27f   : > { %v1016_v34 = vmax.f32 %v1014_v17, %v1015_v22  ;;  %v1021_v35 = vmax.f32 %v1019_v62, %v1020_v26  ;;  %v745_v3 = vadd.f32 %v735_v32, %v704_v18  ;;  %v966_v37 = vadd.f32 %v955_v33, %v926_v21 }
 0x280   : > { %v705_v17 = vadd.f32 %v696_v63, %v2233_v25 }
 0x281   : > { %v1017_v46 = vrot.slane %v1016_v34, 1  ;;  %v1022_v27 = vrot.slane %v1021_v35, 2  ;;  %v750_v50 = vsel %vm748_vm13, %v745_v3, -1e+30  ;;  %v995_v51 = vadd.f32 %v984_v47, %v966_v37 }
 0x282   : > { %v761_v57 = vsel %vm753_vm14, %v750_v50, -inf  ;;  %v961_v58 = vpop.permute.xlu0 %960  ;;  %v739_v59 = vpop.permute.xlu1 %738  ;;  %v2491_v47 = vadd.f32 %v2425_v41, %v2216_v13  ;;  %v1477_v37 = vrot.slane %v2475_v44, 9 }
 0x283   : > { %v2485_v60 = vmax.f32 %v1016_v34, %v1017_v46  ;;  %v1023_v0 = vmax.f32 %v1021_v35, %v1022_v27  ;;  %v762_v1 = vrot.slane %v761_v57, 4  ;;  %v1000_v2 = vsel %vm999_vm11, %v995_v51, -1e+30 }
 0x284   : > { %v1005_v40 = vsel %vm1004_vm12, %v1000_v2, -inf  ;;  %v969_v55 = vadd.f32 %v961_v58, %v929_v53  ;;  %v747_v4 = vadd.f32 %v739_v59, %v706_v56  ;;  %v2514_v56 = vmax.f32 %v2410_v38, %v1479_v43 }
 0x285   : > { %v1024_v5 = vrot.slane %v1023_v0, 1  ;;  %v763_v7 = vmax.f32 %v761_v57, %v762_v1  ;;  %v1006_v12 = vrot.slane %v1005_v40, 4  ;;  %v1098_v16 = vmax.f32 %v2485_v60, %v2480_v52 }
 0x286   : > { %v998_v62 = vadd.f32 %v2429_v48, %v969_v55  ;;  %v752_v13 = vsel %vm748_vm13, %v747_v4, -1e+30  ;;  %v737_v41 = vpop.permute.xlu0 %736  ;;  %v797_v18 = vpop.permute.xlu1 %796 }
 0x287   : > { %v2501_v21 = vmax.f32 %v1023_v0, %v1024_v5  ;;  %v764_v22 = vrot.slane %v763_v7, 2  ;;  %v1007_v26 = vmax.f32 %v1005_v40, %v1006_v12  ;;  %v775_v61 = vsel %vm753_vm14, %v752_v13, -inf }
 0x288   : > { %v1003_v32 = vsel %vm999_vm11, %v998_v62, -1e+30  ;;  %v776_v33 = vrot.slane %v775_v61, 4  ;;  %v746_v63 = vadd.f32 %v737_v41, %v705_v17  ;;  %v805_v15 = vadd.f32 %v797_v18, %v2455_v19 }
 0x289   : > { %v765_v34 = vmax.f32 %v763_v7, %v764_v22  ;;  %v1008_v48 = vrot.slane %v1007_v26, 2  ;;  %v1026_v35 = vsel %vm1004_vm12, %v1003_v32, -inf  ;;  %v1099_v3 = vmax.f32 %v2501_v21, %v2401_v28 }
 0x28a   : > { %v1027_v46 = vrot.slane %v1026_v35, 4  ;;  %v777_v27 = vmax.f32 %v775_v61, %v776_v33  ;;  %v751_v50 = vsel %vm748_vm13, %v746_v63, -1e+30  ;;  %v733_v51 = vpop.permute.xlu0 %732  ;;  %v1040_v53 = vpop.permute.xlu1 %1039  ;;  %v849_v0 = vadd.f32 %v2427_v45, %v2491_v47 }
 0x28b   : > { %v766_v57 = vrot.slane %v765_v34, 1  ;;  %v768_v58 = vsel %vm753_vm14, %v751_v50, -inf  ;;  %v744_v59 = vadd.f32 %v733_v51, %v703_v6  ;;  %v1009_v4 = vmax.f32 %v1007_v26, %v1008_v48 }
 0x28c   : > { %v1028_v1 = vmax.f32 %v1026_v35, %v1027_v46  ;;  %v778_v2 = vrot.slane %v777_v27, 2  ;;  %v769_v40 = vrot.slane %v768_v58, 4  ;;  %v845_v5 = vmax.f32 %v805_v15, %v1477_v37 }
 0x28d   : > { %v767_v55 = vmax.f32 %v765_v34, %v766_v57  ;;  %v749_v7 = vsel %vm748_vm13, %v744_v59, -1e+30  ;;  %v1052_v41 = vadd.f32 %v1040_v53, %v2475_v44  ;;  %v1076_v18 = vadd.f32 %v1040_v53, %v849_v0 }
 0x28e   : > { %v1029_v12 = vrot.slane %v1028_v1, 2  ;;  %v779_v17 = vmax.f32 %v777_v27, %v778_v2  ;;  %v770_v38 = vmax.f32 %v768_v58, %v769_v40  ;;  %v754_v43 = vsel %vm753_vm14, %v749_v7, -inf  ;;  %v791_v62 = vpop.permute.xlu0 %790  ;;  %v2522_v13 = vpop.permute.xlu1 %502 }
 0x28f   : > { %v871_v6 = vmax.f32 %v767_v55, %v2514_v56  ;;  %v755_v45 = vrot.slane %v754_v43, 4  ;;  %v802_v32 = vadd.f32 %v791_v62, %v2448_v8  ;;  %v1481_v33 = vrot.slane %v849_v0, 10 }
 0x290   : > { %v1030_v22 = vmax.f32 %v1028_v1, %v1029_v12  ;;  %v780_v26 = vrot.slane %v779_v17, 1  ;;  %v771_v61 = vrot.slane %v770_v38, 2  ;;  %v1010_v63 = vrot.slane %v1009_v4, 1 }
 0x291   : > { %v756_v34 = vmax.f32 %v754_v43, %v755_v45  ;;  %v1485_v48 = vrot.slane %v1052_v41, 9  ;;  %v1048_v46 = vadd.f32 %v1040_v53, %v805_v15  ;;  %v842_v27 = vmax.f32 %v802_v32, %v1474_v39 }
 0x292   : > { %v772_v35 = vmax.f32 %v770_v38, %v771_v61  ;;  %v781_v37 = vmax.f32 %v779_v17, %v780_v26  ;;  %v1034_v50 = vpop.permute.xlu0 %1033  ;;  %v1031_v44 = vrot.slane %v1030_v22, 1  ;;  %v869_v51 = vmax.f32 %v845_v5, %v1481_v33  ;;  %v499_v2 = vpop.permute.xlu1 %498 }
 0x293   : > { %v757_v56 = vrot.slane %v756_v34, 2  ;;  %v1489_v57 = vrot.slane %v1076_v18, 10  ;;  %v1072_v59 = vmax.f32 %v1048_v46, %v1485_v48  ;;  %v512_v0 = vrot.slane %v2522_v13, 1 }
 0x294   : > { %v773_v58 = vrot.slane %v772_v35, 1  ;;  %v1049_v1 = vadd.f32 %v1034_v50, %v2459_v20  ;;  %v1011_v55 = vmax.f32 %v1009_v4, %v1010_v63  ;;  %v1045_v15 = vadd.f32 %v1034_v50, %v802_v32 }
 0x295   : > { %v758_v40 = vmax.f32 %v756_v34, %v757_v56  ;;  %v1073_v53 = vadd.f32 %v1034_v50, %v2463_v14  ;;  %v873_v7 = vmax.f32 %v781_v37, %v869_v51  ;;  %v866_v5 = vmax.f32 %v842_v27, %v1478_v36 }
 0x296   : > { %v774_v39 = vmax.f32 %v772_v35, %v773_v58  ;;  %v1482_v12 = vrot.slane %v1049_v1, 9  ;;  %v501_v17 = vpop.permute.xlu0 %500  ;;  %v510_v43 = vrot.slane %v499_v2, 1  ;;  %v1032_v13 = vmax.f32 %v1030_v22, %v1031_v44 }
 0x297   : > { %v759_v38 = vrot.slane %v758_v40, 1  ;;  %v511_v62 = vrot.slane %v501_v17, 1  ;;  %v1096_v20 = vmax.f32 %v1072_v59, %v1489_v57  ;;  %v1486_v41 = vrot.slane %v1073_v53, 10 }
 0x298   : > { %v1069_v45 = vmax.f32 %v1045_v15, %v1482_v12  ;;  %v872_v4 = vmax.f32 %v774_v39, %v2395_v9  ;;  %v879_v36 = vrot.slane %v871_v6, 7  ;;  %v883_v63 = vrot.slane %v873_v7, 5 }
 0x299   : > { %v760_v18 = vmax.f32 %v758_v40, %v759_v38  ;;  %v516_v26 = vsel %vm514_vm9, %v511_v62, %v512_v0  ;;  %v517_v14 = vsel %vm514_vm9, %v510_v43, %v511_v62  ;;  %v1100_v35 = vmax.f32 %v1032_v13, %v1096_v20 }
 0x29a   : > { %v1093_v61 = vmax.f32 %v1069_v45, %v1486_v41  ;;  %v519_v32 = vadd.f32 %v517_v14, %v2231_v24  ;;  %v520_v33 = vadd.f32 %v516_v26, %v2244_v30  ;;  %v505_v22 = vpop.permute.xlu0 %504  ;;  %v1106_v9 = vrot.slane %v1098_v16, 7 }
 0x29b   : > { %v870_v34 = vmax.f32 %v760_v18, %v866_v5  ;;  %v513_v48 = vrot.slane %v505_v22, 1  ;;  %v1108_v24 = vrot.slane %v1099_v3, 6  ;;  %v881_v28 = vrot.slane %v872_v4, 6 }
 0x29c   : > { %v1097_v37 = vmax.f32 %v1011_v55, %v1093_v61  ;;  %v524_v46 = vsel %vm523_vm15, %v519_v32, -1e+30  ;;  %v525_v6 = vsel %vm523_vm15, %v520_v33, -1e+30  ;;  %v1110_v3 = vrot.slane %v1100_v35, 5 }
 0x29d   : > { %v529_v30 = vsel %vm528_vm0, %v524_v46, -inf  ;;  %v536_v27 = vsel %vm528_vm0, %v525_v6, -inf  ;;  %v515_v50 = vsel %vm514_vm9, %v512_v0, %v513_v48  ;;  %v518_v52 = vsel %vm514_vm9, %v513_v48, %v510_v43 }
 0x29e   : > { %v530_v60 = vrot.slane %v529_v30, 4  ;;  %v537_v16 = vrot.slane %v536_v27, 4  ;;  %v521_v44 = vadd.f32 %v515_v50, %v2233_v25  ;;  %v522_v51 = vadd.f32 %v518_v52, %v2246_v31  ;;  %v649_v52 = vld [vmem:[#allocation3] sm:$0xf] }
 0x29f   : > { %v880_v56 = vsel %vm655_vm1, %v879_v36, %v870_v34  ;;  %v1107_v21 = vsel %vm655_vm1, %v1106_v9, %v1097_v37  ;;  %v1462_v39 = vrot.slane %v2448_v8, 9  ;;  %v1467_v7 = vrot.slane %v2433_v54, 10 }
 0x2a0   : > { %v531_v57 = vmax.f32 %v529_v30, %v530_v60  ;;  %v538_v58 = vmax.f32 %v536_v27, %v537_v16  ;;  %v526_v59 = vsel %vm523_vm15, %v521_v44, -1e+30  ;;  %v527_v0 = vsel %vm523_vm15, %v522_v51, -1e+30  ;;  %v874_v16 = vld [vmem:[#allocation4] sm:$0xf] }
 0x2a1   : > { %v543_v1 = vsel %vm528_vm0, %v526_v59, -inf  ;;  %v550_v25 = vsel %vm528_vm0, %v527_v0, -inf  ;;  %v882_v31 = vsel %vm658_vm2, %v881_v28, %v880_v56  ;;  %v1109_v2 = vsel %vm658_vm2, %v1108_v24, %v1107_v21  ;;  %v1101_v44 = vld [vmem:[#allocation5] sm:$0xf]  ;;  %v1492_v0 = vld [vmem:[%s2677_s3] ss:$0 sm:$0xff] (!%p1490_p7) }
 0x2a2   : > { %v532_v40 = vrot.slane %v531_v57, 2  ;;  %v539_v55 = vrot.slane %v538_v58, 2  ;;  %v544_v15 = vrot.slane %v543_v1, 4  ;;  %v551_v53 = vrot.slane %v550_v25, 4 }
 0x2a3   : > { %v884_v5 = vsel %vm661_vm3, %v883_v63, %v882_v31  ;;  %v1111_v23 = vsel %vm661_vm3, %v1110_v3, %v1109_v2  ;;  %v1464_v62 = vrot.slane %v2363_v49, 9  ;;  %v1466_v13 = vrot.slane %v2443_v10, 10  ;;  %v1684_v3 = vld [vmem:[#allocation11 + $0x8] sm:$0xff] (!%p1490_p7)   ;;  %v1491_v31 = vld [vmem:[%s2676_s2] ss:$0 sm:$0xff] (!%p1490_p7) }
 0x2a4   : > { %v533_v12 = vmax.f32 %v531_v57, %v532_v40  ;;  %v540_v17 = vmax.f32 %v538_v58, %v539_v55  ;;  %v545_v38 = vmax.f32 %v543_v1, %v544_v15  ;;  %v552_v43 = vmax.f32 %v550_v25, %v551_v53  ;;  %885 = vrot.lane.b32.xlu0 %v884_v5, %s1916_s16  ;;  %v1685_v58 = vld [vmem:[#allocation11] sm:$0xff] (!%p1490_p7)   ;;  %v1686_v40 = vld [vmem:[#allocation11 + $0x10] sm:$0xff] (!%p1490_p7)  }
 0x2a5   : > { %v602_v20 = vmax.f32 %v2353_v42, %v1463_v29  ;;  %v1465_v54 = vrot.slane %v2455_v19, 9  ;;  %1112 = vrot.lane.b32.xlu1 %v1111_v23, %s1917_s7  ;;  %v1468_v26 = vrot.slane %v2385_v11, 10  ;;  %v601_v14 = vmax.f32 %v2448_v8, %v1462_v39  ;;  %v1493_v15 = vld [vmem:[%s2678_s4] ss:$0 sm:$0xff] (!%p1490_p7) }
 0x2a6   : > { %v534_v45 = vrot.slane %v533_v12, 1  ;;  %v541_v41 = vrot.slane %v540_v17, 1  ;;  %v546_v4 = vrot.slane %v545_v38, 2  ;;  %v553_v18 = vrot.slane %v552_v43, 2 }
 0x2a7   : > { %v642_v36 = vmax.f32 %v602_v20, %v1467_v7  ;;  %v1469_v61 = vrot.slane %v2491_v47, 10  ;;  %v603_v42 = vmax.f32 %v2363_v49, %v1464_v62  ;;  %v604_v29 = vmax.f32 %v2455_v19, %v1465_v54 }
 0x2a8   : > { %v535_v10 = vmax.f32 %v533_v12, %v534_v45  ;;  %v542_v32 = vmax.f32 %v540_v17, %v541_v41  ;;  %v547_v33 = vmax.f32 %v545_v38, %v546_v4  ;;  %v554_v22 = vmax.f32 %v552_v43, %v553_v18  ;;  %v1500_v41 = vld [vmem:[%s2722_s18] ss:$0 sm:$0xff] (!%p1490_p7) }
 0x2a9   : > { %v641_v63 = vmax.f32 %v601_v14, %v1466_v13  ;;  %v643_v9 = vmax.f32 %v603_v42, %v1468_v26  ;;  %v644_v37 = vmax.f32 %v604_v29, %v1469_v61  ;;  %v1918_v57 = vmov (!%p1490_p7), 0.0  }
 0x2aa   : > { %v548_v34 = vrot.slane %v547_v33, 1  ;;  %v555_v48 = vrot.slane %v554_v22, 1  ;;  %v646_v35 = vmax.f32 %v542_v32, %v642_v36  ;;  %1512 = vmatprep.subr.bf16.mxu0 (!%p1490_p7), %v1918_v57  ;;  %1518 = vmatprep.subr.bf16.mxu1 (!%p1490_p7), %v1918_v57 }
 0x2ab   : > { %v645_v8 = vmax.f32 %v535_v10, %v641_v63  ;;  %1513 = vmatpush3.bf16.msra.mxu0 (!%p1490_p7), %v1684_v3  ;;  %1514 = vmatprep.mubr.msk.bf16.mxu0 (!%p1490_p7), %vm1919_vm5, %v1918_v57 }
 0x2ac   : > { %v549_v11 = vmax.f32 %v547_v33, %v548_v34  ;;  %v556_v46 = vmax.f32 %v554_v22, %v555_v48  ;;  %v654_v6 = vrot.slane %v646_v35, 7  ;;  %1519 = vmatpush3.bf16.msra.mxu1 (!%p1490_p7), %v1685_v58  ;;  %1520 = vmatprep.mubr.msk.bf16.mxu1 (!%p1490_p7), %vm1919_vm5, %v1918_v57 }
 0x2ad   : > { %1524 = vmatprep.subr.bf16.mxu0 (!%p1490_p7), %v1918_v57 }
 0x2ae   : > { %v647_v24 = vmax.f32 %v549_v11, %v643_v9  ;;  %v648_v47 = vmax.f32 %v556_v46, %v644_v37  ;;  %v656_v30 = vsel %vm655_vm1, %v654_v6, %v645_v8 }
 0x2b0   : > { %v657_v27 = vrot.slane %v647_v24, 6  ;;  %v660_v50 = vrot.slane %v648_v47, 5 }
 0x2b2   : > { %v659_v49 = vsel %vm658_vm2, %v657_v27, %v656_v30 }
 0x2b3   : > { %v662_v19 = vsel %vm661_vm3, %v660_v50, %v659_v49 }
 0x2b4   : > { %v664_v60 = vmax.f32 %v649_v52, %v662_v19 }
 0x2b6   : > { %666 = vst.msk [vmem:[#allocation3] sm:$0xf] %vm665_vm4, %v664_v60 }
 0x2bd   : > { %v1121_v1 = vld [vmem:[#allocation3] sm:$0xf] (!%p1490_p7) }
 0x2be   : > { %v1129_v2 = vadd.f32 (!%p1490_p7), %v1491_v31, %v1121_v1 }
 0x2c0   : > { %v1130_v39 = vpack.c.bf16 (!%p1490_p7), %v1129_v2, %v1129_v2 }
 0x2c2   : > { %1521 = vmatmul.mubr.msk.bf16.vlgmr.msra.gmra.mrb[0].mxu1 (!%p1490_p7), %vm528_vm0, %v1130_v39 }
 0x314   : > { %1120 = sbr.rel (%p1490_p7) target bundleno = 1030 (0x406), region = 68 }
 0x316   : > { %v886_v51 = vpop.permute.xlu0 %885 }
 0x317   : > { %v888_v56 = vmax.f32 %v874_v16, %v886_v51  ;;  %v1113_v28 = vpop.permute.xlu1 %1112 }
 0x318   : > { %v1115_v21 = vmax.f32 %v1101_v44, %v1113_v28 }
 0x319   : > { %889 = vst.msk [vmem:[#allocation4] sm:$0xf] %vm665_vm4, %v888_v56 }
 0x31a   : > { %1116 = vst.msk [vmem:[#allocation5] sm:$0xf] %vm665_vm4, %v1115_v21 }
 0x320   : > { %v1131_v59 = vld [vmem:[#allocation4] sm:$0xf] }
 0x321   : > { %v1139_v25 = vadd.f32 %v1492_v0, %v1131_v59  ;;  %v1141_v55 = vld [vmem:[#allocation5] sm:$0xf] }
 0x322   : > { %v1149_v7 = vadd.f32 %v1493_v15, %v1141_v55 }
 0x323   : > { %v1140_v53 = vpack.c.bf16 %v1139_v25, %v1139_v25 }
 0x324   : > { %v1150_v5 = vpack.c.bf16 %v1149_v7, %v1149_v7 }
 0x325   : > { %1515 = vmatmul.mubr.msk.bf16.vlgmr.msra.gmra.mrb[0].mxu0 %vm528_vm0, %v1140_v53 }
 0x326   : > { %1525 = vmatpush3.bf16.msra.mxu0 %v1686_v40  ;;  %1526 = vmatprep.mubr.msk.bf16.mxu0 %vm1919_vm5, %v1918_v57 }
 0x32d   : > { %1527 = vmatmul.mubr.msk.bf16.vlgmr.msra.gmra.mrb[4].mxu0 %vm528_vm0, %v1150_v5 }
 0x395   : > { %v1247_v17 = vpop.f32.mrb[0].mxu1 }
 0x396   : > { %v1522_v62 = vpop.f32.mrb[1].mxu1 }
 0x397   : > { %v1250_v20 = vpop.f32.mrb[2].mxu1 }
 0x398   : > { %v1523_v54 = vpop.f32.mrb[3].mxu1 }
 0x3f8   : > { %v1198_v23 = vpop.f32.mrb[0].mxu0 }
 0x3f9   : > { %v1516_v12 = vpop.f32.mrb[1].mxu0  ;;  %v1248_v38 = vadd.f32 %v1247_v17, %v1198_v23 }
 0x3fa   : > { %v1201_v43 = vpop.f32.mrb[2].mxu0 }
 0x3fb   : > { %v1517_v13 = vpop.f32.mrb[3].mxu0 }
 0x400   : > { %v1298_v45 = vpop.f32.mrb[4].mxu0 }
 0x401   : > { %v1304_v4 = vadd.f32 %v1298_v45, %v1248_v38  ;;  %v1528_v18 = vpop.f32.mrb[5].mxu0 }
 0x402   : > { %v1301_v26 = vpop.f32.mrb[6].mxu0 }
 0x403   : > { %v1312_v14 = vadd.f32 %v1500_v41, %v1304_v4  ;;  %v1529_v36 = vpop.f32.mrb[7].mxu0 }
 0x405   : > { %1313 = vst [vmem:[%s341_s24] sm:$0xf] %v1312_v14 }
 0x406 PF: > { %s2723_s8 = sld [smem:[#allocation17_spill]]  ;;  %s2724_s6 = sld [smem:[#allocation19_spill]] }
 0x407   : > { %s2725_s1 = sld [smem:[#allocation24_spill]]  ;;  %s1328_s30 = sshll.u32 %s341_s24, 4  ;;  %s1329_s30 = int_to_ptr.vmem [resolvable:$true] %s1328_s30 }
 0x408   : > { %s1315_s19 = scalar_lea.sflag [#allocation8], %s339_s21  ;;  %s1773_s11 = scalar_lea.vmem %s1329_s30, 64 }
 0x409   : > { %p1774_p6 = scmp.ne.s32.totalorder %s1329_s30, %s1773_s11  ;;  %s1920_s22 = smov [#allocation12]  }
 0x40a   : > { %s1777_s17 = sshll.u32 %s1920_s22, 4  ;;  %s1778_s17 = int_to_ptr.vmem [resolvable:$false] %s1777_s17 }
 0x40b   : > { %s1779_s15 = scalar_lea.vmem %s1778_s17, 128  ;;  %p1780_p12 = scmp.lt.s32.totalorder %s1329_s30, %s1778_s17 }
 0x40c   : > { %s1502_s27 = sshll.u32 %s2723_s8, 6  ;;  %p2726_p9 = scmp.ne.s32.totalorder %s2724_s6, 0 }
 0x40d   : > { %s2614_s14 = scalar_lea.hbm %s2725_s1, %s1502_s27  ;;  %p1781_p11 = scmp.lt.s32.totalorder %s1779_s15, %s1773_s11 }
 0x40e   : > { %p1775_p10 = pnand %p1774_p6, %p2726_p9 }
 0x40f   : > { %p1782_p1 = por %p1781_p11, %p1780_p12 }
 0x410   : > { %p1776_p5 = pneg %p1775_p10 }
 0x412   : > { %p1783_p8 = pnand %p1782_p1, %p1776_p5 }
 0x414   : > { %1786 = shalt.err (!%p1783_p8)
}
 0x415   : > { %s1787_s21 = scalar_lea.hbm %s2614_s14, 64  ;;  %s1791_s18 = scalar_lea.hbm %s2725_s1, 128 }
 0x416   : > { %p1788_p4 = scmp.ne.s32.totalorder %s2614_s14, %s1787_s21  ;;  %p1792_p2 = scmp.lt.u32.totalorder %s2614_s14, %s2725_s1 }
 0x417   : > { %p1793_p0 = scmp.lt.u32.totalorder %s1791_s18, %s1787_s21  ;;  %p1795_p6 = scmp.lt.u32.totalorder %s1787_s21, %s2614_s14 }
 0x418   : > { %p1789_p3 = pnand %p1788_p4, %p2726_p9 }
 0x419   : > { %p1794_p7 = por %p1793_p0, %p1792_p2 }
 0x41a   : > { %p1790_p13 = pneg %p1789_p3 }
 0x41b   : > { %p1796_p10 = por %p1795_p6, %p1794_p7 }
 0x41d   : > { %p1797_p5 = pnand %p1796_p10, %p1790_p13 }
 0x41f   : > { %1800 = shalt.err (!%p1797_p5)
}
 0x420   : > { %1546 = dma.vmem_to_hbm [thread:$0]  (%p2726_p9), %s1329_s30, 64, %s2614_s14, %s1315_s19  }
 0x421 PF: > { %s2727_s16 = sld [smem:[#allocation18_spill]]  ;;  %s2728_s7 = sld [smem:[#allocation16_spill]] }
 0x422   : > { %s2729_s11 = sld [smem:[#allocation20_spill]] }
 0x427   : > { %p1568_p12 = scmp.ge.s32.totalorder %s2727_s16, 2  ;;  %s1340_s22 = sand.u32 1, %s2728_s7  }
 0x428   : > { %p2730_p11 = scmp.ne.s32.totalorder %s2729_s11, 0  ;;  %s1341_s17 = scalar_lea.sflag [#allocation8], %s1340_s22 }
 0x42a   : > { %p1560_p1 = pnand %p1568_p12, %p2730_p11 }
 0x42c   : > { %1854 = dma.done.wait (!%p1560_p1), %s1341_s17, 64  }
 0x42d   : > { %1856 = vsyncadd (!%p1560_p1), %s1341_s17, 4294967232  ;;  %s24_s11 = sadd.s32 1, %s2727_s16   ;;  %s2731_s24 = smov %s1863_s25 }
 0x42e   : > { %p21_p8 = scmp.ge.s32.totalorder %s24_s11, 6   ;;  %s2732_s25 = smov %s1867_s26 }
 0x42f   : > { %s2733_s26 = smov %s2152_s5  ;;  %s2734_s27 = smov %s1875_s28 }
 0x430   : > { %s2735_s28 = smov %s1879_s29  ;;  %s2736_s29 = smov %s2157_s23 }
 0x431   : > { %s2737_s30 = smov %s1891_s9  ;;  %s2738_s8 = smov %s1895_s10 }
 0x432   : > { %s2739_s9 = smov %s2742_s20  ;;  %s2740_s10 = smov %s2746_s13 }
 0x433   :  { %23 = sbr.rel (!%p21_p8) target bundleno = 15 (0xf), region = 109 }
 0x43a   :  { %1346 = vsyncpa [#allocation7], 1 }
 0x43b   :  { %1348 = vsyncpa [#allocation7 + $0x1], 1 }
 0x43c   :  { %1349 = vsyncpa [#allocation10], 1 }
 0x43d   :  { %1350 = vsyncpa [#allocation8], 1 }
 0x43e   :  { %1352 = vsyncpa [#allocation8 + $0x1], 1 }

</bundles_post_ra>
